<compile_context>
chip_gen: v6e
topology: v6e:2x2x1
jax: 0.10.0
libtpu: 0.0.40
codegen_flags: <defaults>
</compile_context>

<pallas_src>
import functools
import math

import jax
import jax.numpy as jnp
from jax import lax
from jax.experimental import pallas as pl
from jax.experimental.pallas import tpu as pltpu

BN_EPS = 1e-5
BN_CONST = 1.0 / math.sqrt(1.0 + BN_EPS)   # eval-mode BatchNorm scale


# --------------------------------------------------------------------------- kernel
def _gkt_fused_kernel(C, H, E, BT, RC, Sm1,
                      # scalar prefetch (SMEM)
                      q_ref, f_ref, bn_ref,
                      # resident tensors (VMEM)
                      emb_x_ref, emb_c_ref, graph_ref, graph_t_ref,
                      w_self_ref, bs1_ref, ws2_ref, bs2_ref,
                      w_nbr_gh_ref, b1c_ref, w2b_ref, b2c_ref,
                      wea_ref, bea_ref, eaw_ref,
                      wih_ref, bih_ref, bhh_ref,
                      wp_ref, bp_ref,
                      # outputs
                      pred_ref,
                      # scratch
                      ht_ref):
    f32 = jnp.float32
    bf16 = jnp.bfloat16
    bt = pl.program_id(0)
    s = pl.program_id(1)
    b0 = bt * BT
    H2 = 2 * H

    @pl.when(s == 0)
    def _init():
        ht_ref[...] = jnp.zeros_like(ht_ref)
        pred_ref[...] = jnp.zeros_like(pred_ref)

    # MLP.batch_norm skips BN when the masked batch has a single row (f_self only).
    bn_self = jnp.where(bn_ref[s] == 1, 1.0, BN_CONST).astype(f32)

    ht_bc = ht_ref[...]                        # [BT*C, H]  (student-major rows)
    emb_c = emb_c_ref[...]                     # [C, E]
    graph = graph_ref[...]                     # [C, C]
    graph_t = graph_t_ref[...]                 # [C, C]
    iota_c = lax.broadcasted_iota(jnp.int32, (C, 1), 0)
    iota_l = lax.broadcasted_iota(jnp.int32, (1, C), 1)

    # ---------------- per-student gathers (unrolled, BT is small & static) ----------
    mask_bools, qoh_cols, cemb_rows = [], [], []
    adj_rows, radj_rows, vf_rows = [], [], []
    selfh_rows, selfe_rows = [], []
    for j in range(BT):
        qt_j = q_ref[b0 + j, s]
        mask_j = qt_j != -1
        maskf_j = mask_j.astype(f32)
        qtc_j = jnp.where(mask_j, qt_j, 0)
        xtc_j = jnp.minimum(f_ref[b0 + j, s], RC - 1)

        qoh_col = (iota_c == qtc_j).astype(f32)                      # [C, 1]
        qoh_row = (iota_l == qtc_j).astype(f32)                      # [1, C]
        x_emb_j = emb_x_ref[pl.ds(xtc_j, 1), :]                      # [1, E]
        # concept/response embedding: x_emb at the answered concept, emb_c elsewhere,
        # zero for padded (qt == -1) students.
        cemb_j = maskf_j * (qoh_col * x_emb_j + (1.0 - qoh_col) * emb_c)   # [C, E]
        # adj[c]  = graph[qt, c],  radj[c] = graph.T[qt, c]  (as [C,1] columns)
        adj_j = jnp.sum(graph_t * qoh_row, axis=1, keepdims=True)    # [C, 1]
        radj_j = jnp.sum(graph * qoh_row, axis=1, keepdims=True)     # [C, 1]
        ht_self_j = ht_ref[pl.ds(j * C + qtc_j, 1), :]               # [1, H]

        mask_bools.append(mask_j)
        qoh_cols.append(qoh_col)
        cemb_rows.append(cemb_j)
        adj_rows.append(adj_j)
        radj_rows.append(radj_j)
        vf_rows.append(jnp.broadcast_to(maskf_j, (C, 1)))
        selfh_rows.append(ht_self_j)
        selfe_rows.append(x_emb_j)

    def cat0(xs):
        return xs[0] if len(xs) == 1 else jnp.concatenate(xs, axis=0)

    cemb_bc = cat0(cemb_rows)                                        # [BT*C, E]
    adj_all = cat0(adj_rows)                                         # [BT*C, 1]
    radj_all = cat0(radj_rows)                                       # [BT*C, 1]
    qoh_all = cat0(qoh_cols)                                         # [BT*C, 1]
    vf = cat0(vf_rows)                                               # [BT*C, 1]
    self_in = jnp.concatenate([cat0(selfh_rows), cat0(selfe_rows)], axis=1)  # [BT, HE]

    # ---------------- f_self + self contributions to both neighbor MLPs -------------
    big_self = jnp.dot(self_in.astype(bf16), w_self_ref[...],
                       preferred_element_type=f32)                   # [BT, 3H]
    a1s = jnp.maximum(big_self[:, :H] + bs1_ref[...], 0.0)
    self_feat = jnp.maximum(
        jnp.dot(a1s.astype(bf16), ws2_ref[...], preferred_element_type=f32)
        + bs2_ref[...], 0.0) * bn_self                               # [BT, H]
    sp01 = big_self[:, H:]                                           # [BT, 2H]

    # -------- neighbor MLPs fc1 (concept part) + GRU hidden gates, one matmul -------
    # Both consume the pre-update ht; the GRU-hidden columns of the fused weight have
    # zeros against the embedding rows.
    tmp_bc = jnp.concatenate([ht_bc, cemb_bc], axis=1)               # [BT*C, HE]
    cgh = jnp.dot(tmp_bc.astype(bf16), w_nbr_gh_ref[...],
                  preferred_element_type=f32)                        # [BT*C, 5H]
    cpart = cgh[:, :H2]                                              # [BT*C, 2H]
    gh = cgh[:, H2:] + bhh_ref[...]                                  # [BT*C, 3H]

    spb = cat0([jnp.broadcast_to(sp01[j:j + 1, :], (C, H2)) for j in range(BT)])
    a01 = jnp.maximum(cpart + spb + b1c_ref[...], 0.0)
    f01 = jnp.maximum(
        jnp.dot(a01.astype(bf16), w2b_ref[...], preferred_element_type=f32)
        + b2c_ref[...], 0.0) * BN_CONST                              # [BT*C, 2H]
    neigh = adj_all * f01[:, :H] + radj_all * f01[:, H:]             # [BT*C, H]

    # splice self features back at the answered concept row
    splice = cat0([qoh_cols[j] * self_feat[j:j + 1, :] for j in range(BT)])
    m_next = (1.0 - qoh_all) * neigh + splice                        # [BT*C, H]

    # ---------------- erase & add gate (erase || add fused) -------------------------
    ea_pre = jnp.dot(m_next.astype(bf16), wea_ref[...],
                     preferred_element_type=f32) + bea_ref[...]      # [BT*C, 2H]
    erase = jax.nn.sigmoid(ea_pre[:, :H])
    add = jnp.tanh(ea_pre[:, H:])
    eawv = eaw_ref[...]                                              # [BT*C, H]
    ea = m_next - eawv * erase * m_next + eawv * add

    # ---------------- GRU cell, input gates (r | z | n) fused -----------------------
    gi = jnp.dot(ea.astype(bf16), wih_ref[...], preferred_element_type=f32) + bih_ref[...]
    r = jax.nn.sigmoid(gi[:, :H] + gh[:, :H])
    z = jax.nn.sigmoid(gi[:, H:H2] + gh[:, H:H2])
    n = jnp.tanh(gi[:, H2:] + r * gh[:, H2:])
    h_gru = (1.0 - z) * n + z * ht_bc

    # padded students keep their old hidden state
    h_next = vf * h_gru + (1.0 - vf) * ht_bc
    ht_ref[...] = h_next

    # ---------------- prediction for the question answered at the next step ---------
    wp_v = wp_ref[...]                                               # [1, H]
    bp_v = bp_ref[...]                                               # [1, 1]
    y_rows = []
    for j in range(BT):
        qn_j = q_ref[b0 + j, s + 1]
        mask_n = qn_j != -1
        qnc_j = jnp.where(mask_n, qn_j, 0)
        hrow = ht_ref[pl.ds(j * C + qnc_j, 1), :]                    # [1, H]
        y_lin = jnp.sum(hrow * wp_v, axis=1, keepdims=True) + bp_v   # [1, 1]
        # sigmoid only for students that answered at the current step (qt != -1);
        # zero when there is no question at the next step.
        y_j = jnp.where(mask_bools[j], jax.nn.sigmoid(y_lin), y_lin)
        y_rows.append(jnp.where(mask_n, y_j, 0.0))
    y_col = cat0(y_rows)                                             # [BT, 1]

    # write the step's scalar into the resident output block (lane-masked select)
    lane = lax.broadcasted_iota(jnp.int32, (BT, Sm1), 1)
    pred_ref[...] = jnp.where(lane == s, y_col, pred_ref[...])


# ------------------------------------------------------------------------ pallas_call
def make_gkt_fused(B, S, C, H, E, RC, BT):
    assert S >= 2, "need at least two timestamps"
    assert B % BT == 0
    Sm1 = S - 1
    NBT = B // BT
    HE = H + E
    kernel = functools.partial(_gkt_fused_kernel, C, H, E, BT, RC, Sm1)

    def resident(shape):
        nd = len(shape)
        return pl.BlockSpec(shape, lambda *_: (0,) * nd)

    in_specs = [
        resident((RC, E)),          # emb_x
        resident((C, E)),           # emb_c (first C rows)
        resident((C, C)),           # graph
        resident((C, C)),           # graph^T
        resident((HE, 3 * H)),      # [ws1 | w01[:HE] | w11[:HE]]        (bf16)
        resident((1, H)),           # bs1
        resident((H, H)),           # ws2                                (bf16)
        resident((1, H)),           # bs2
        resident((HE, 5 * H)),      # [w01[HE:] | w11[HE:] | whh(r|z|n) zero-padded]  (bf16)
        resident((1, 2 * H)),       # [b01 | b11]
        resident((2 * H, 2 * H)),   # blockdiag(w02, w12)                (bf16)
        resident((1, 2 * H)),       # [b02 | b12]
        resident((H, 2 * H)),       # [we | wa]                          (bf16)
        resident((1, 2 * H)),       # [be | ba]
        resident((BT * C, H)),      # erase-add concept weight (tiled per student)
        resident((H, 3 * H)),       # GRU W_ih (r|z|n)                   (bf16)
        resident((1, 3 * H)),       # GRU b_ih
        resident((1, 3 * H)),       # GRU b_hh
        resident((1, H)),           # predict weight (row)
        resident((1, 1)),           # predict bias
    ]
    grid_spec = pltpu.PrefetchScalarGridSpec(
        num_scalar_prefetch=3,                       # questions, feat_idx, bn flag
        grid=(NBT, Sm1),
        in_specs=in_specs,
        out_specs=pl.BlockSpec((BT, Sm1), lambda bt, s, *_: (bt, 0)),
        scratch_shapes=[pltpu.VMEM((BT * C, H), jnp.float32)])      # ht accumulator
    return pl.pallas_call(
        kernel,
        grid_spec=grid_spec,
        out_shape=jax.ShapeDtypeStruct((B, Sm1), jnp.float32),
        compiler_params=pltpu.CompilerParams(
            dimension_semantics=("parallel", "arbitrary")))


# --------------------------------------------------------------------------- wrapper
def prepare_weights(params, C, H, E, BT):
    HE = H + E
    bf = jnp.bfloat16
    zH = jnp.zeros((H, H), jnp.float32)
    w_self = jnp.concatenate(
        [params['ws1'], params['w01'][:HE], params['w11'][:HE]], axis=1).astype(bf)
    # neighbor-fc1 concept parts fused with the GRU hidden-gate weights (zero rows
    # against the embedding part of tmp_ht, which the GRU never sees).
    w_nbr = jnp.concatenate([params['w01'][HE:], params['w11'][HE:]], axis=1)       # [HE, 2H]
    whh_cat = jnp.concatenate([params['whh'][0], params['whh'][1], params['whh'][2]],
                              axis=1)                                                # [H, 3H]
    whh_pad = jnp.concatenate([whh_cat, jnp.zeros((E, 3 * H), jnp.float32)], axis=0)  # [HE, 3H]
    w_nbr_gh = jnp.concatenate([w_nbr, whh_pad], axis=1).astype(bf)                  # [HE, 5H]
    w2blk = jnp.concatenate(
        [jnp.concatenate([params['w02'], zH], axis=1),
         jnp.concatenate([zH, params['w12']], axis=1)], axis=0).astype(bf)
    b1c = jnp.concatenate([params['b01'], params['b11']], axis=1)
    b2c = jnp.concatenate([params['b02'], params['b12']], axis=1)
    wea = jnp.concatenate([params['we'], params['wa']], axis=1).astype(bf)
    bea = jnp.concatenate([params['be'], params['ba']], axis=1)
    eaw_bc = jnp.tile(jnp.broadcast_to(params['eaw'], (C, H)), (BT, 1))
    wih = jnp.concatenate([params['wih'][0], params['wih'][1], params['wih'][2]],
                          axis=1).astype(bf)
    bih = jnp.concatenate([params['bih'][0], params['bih'][1], params['bih'][2]], axis=1)
    bhh = jnp.concatenate([params['bhh'][0], params['bhh'][1], params['bhh'][2]], axis=1)
    return (params['emb_x'], params['emb_c'][:C],
            params['graph'], params['graph'].T,
            w_self, params['bs1'], params['ws2'].astype(bf), params['bs2'],
            w_nbr_gh, b1c, w2blk, b2c,
            wea, bea, eaw_bc,
            wih, bih, bhh,
            params['wp'].T, params['bp'])


def gkt_forward(params, features, questions, *, C, H, E, R, BT=None):
    B, S = features.shape
    if BT is None:
        BT = B
    feat_idx = jnp.where(questions >= 0, questions * R + features, C * R).astype(jnp.int32)
    q_i32 = questions.astype(jnp.int32)
    mask_num = jnp.sum((questions != -1).astype(jnp.int32), axis=0)      # [S]
    bn_flag = (mask_num == 1).astype(jnp.int32)                          # [S]
    weights = prepare_weights(params, C, H, E, BT)
    call = make_gkt_fused(B, S, C, H, E, R * C, BT)
    return call(q_i32, feat_idx, bn_flag, *weights)                      # [B, S-1]


# ------------------------------------------------------------------------ params init
def init_params(key, C, H, E, R):
    HE = H + E
    ks = iter(jax.random.split(key, 40))

    def lin(k, fan_in, fan_out, xavier=True):
        if xavier:  # MLP layers: xavier_normal weight, bias = 0.1
            std = math.sqrt(2.0 / (fan_in + fan_out))
            w = std * jax.random.normal(k, (fan_in, fan_out), jnp.float32)
            b = jnp.full((1, fan_out), 0.1, jnp.float32)
        else:       # default torch Linear init
            bound = 1.0 / math.sqrt(fan_in)
            k1, k2 = jax.random.split(k)
            w = jax.random.uniform(k1, (fan_in, fan_out), jnp.float32, -bound, bound)
            b = jax.random.uniform(k2, (1, fan_out), jnp.float32, -bound, bound)
        return w, b

    p = {}
    p['emb_x'] = jax.random.normal(next(ks), (R * C, E), jnp.float32)
    emb_c = jax.random.normal(next(ks), (C + 1, E), jnp.float32)
    p['emb_c'] = emb_c.at[C].set(0.0)             # padding_idx=-1 -> last row zero
    p['ws1'], p['bs1'] = lin(next(ks), HE, H)
    p['ws2'], p['bs2'] = lin(next(ks), H, H)
    p['w01'], p['b01'] = lin(next(ks), 2 * HE, H)
    p['w02'], p['b02'] = lin(next(ks), H, H)
    p['w11'], p['b11'] = lin(next(ks), 2 * HE, H)
    p['w12'], p['b12'] = lin(next(ks), H, H)
    p['we'], p['be'] = lin(next(ks), H, H, xavier=False)
    p['wa'], p['ba'] = lin(next(ks), H, H, xavier=False)
    stdv = 1.0 / math.sqrt(C)
    p['eaw'] = jax.random.uniform(next(ks), (C, 1), jnp.float32, -stdv, stdv)
    bound = 1.0 / math.sqrt(H)
    p['wih'] = jax.random.uniform(next(ks), (3, H, H), jnp.float32, -bound, bound)
    p['bih'] = jax.random.uniform(next(ks), (3, 1, H), jnp.float32, -bound, bound)
    p['whh'] = jax.random.uniform(next(ks), (3, H, H), jnp.float32, -bound, bound)
    p['bhh'] = jax.random.uniform(next(ks), (3, 1, H), jnp.float32, -bound, bound)
    p['wp'], p['bp'] = lin(next(ks), H, 1, xavier=False)
    # synthetic dense concept graph (stand-in for get_concept_graph)
    p['graph'] = jax.random.uniform(next(ks), (C, C), jnp.float32)
    return p


# ---------------------------------------------------------------- pure-JAX reference
def gkt_reference(params, features, questions, *, C, H, E, R):
    """Straightforward f32 JAX translation of the PyTorch forward (eval mode)."""
    B, S = features.shape
    graph = params['graph']
    graph_t = graph.T
    feat_idx = jnp.where(questions >= 0, questions * R + features, C * R)
    ht = jnp.zeros((B, C, H), jnp.float32)
    arangeB = jnp.arange(B)
    arangeC = jnp.arange(C)

    def mlp(x, w1, b1, w2, b2, scale):
        a = jnp.maximum(jnp.dot(x, w1) + b1, 0.0)
        a = jnp.maximum(jnp.dot(a, w2) + b2, 0.0)
        return a * scale

    preds = []
    for i in range(S):
        qt = questions[:, i]
        mask = qt != -1
        qtc = jnp.where(mask, qt, 0)
        xtc = jnp.clip(feat_idx[:, i], 0, R * C - 1)
        x_emb = params['emb_x'][xtc]                       # [B, E]
        base_c = params['emb_c'][:C]                       # [C, E]
        is_q = arangeC[None, :] == qtc[:, None]            # [B, C]
        cemb = jnp.where(mask[:, None, None],
                         jnp.where(is_q[:, :, None], x_emb[:, None, :], base_c[None]),
                         0.0)
        tmp_ht = jnp.concatenate([ht, cemb], axis=-1)      # [B, C, HE]
        self_ht = tmp_ht[arangeB, qtc]                     # [B, HE]
        mask_num = jnp.sum(mask.astype(jnp.int32))
        bn_self = jnp.where(mask_num == 1, 1.0, BN_CONST)
        self_feat = mlp(self_ht, params['ws1'], params['bs1'],
                        params['ws2'], params['bs2'], bn_self)
        neigh_in = jnp.concatenate(
            [jnp.broadcast_to(self_ht[:, None, :], (B, C, H + E)), tmp_ht], axis=-1)
        f0 = mlp(neigh_in, params['w01'], params['b01'],
                 params['w02'], params['b02'], BN_CONST)
        f1 = mlp(neigh_in, params['w11'], params['b11'],
                 params['w12'], params['b12'], BN_CONST)
        adj = graph[qtc][:, :, None]
        radj = graph_t[qtc][:, :, None]
        neigh = adj * f0 + radj * f1
        qoh = is_q.astype(jnp.float32)[:, :, None]
        m_next = (1.0 - qoh) * neigh + qoh * self_feat[:, None, :]
        erase = jax.nn.sigmoid(jnp.dot(m_next, params['we']) + params['be'])
        add = jnp.tanh(jnp.dot(m_next, params['wa']) + params['ba'])
        eaw = params['eaw'][None]
        ea = m_next - eaw * erase * m_next + eaw * add

        def gate(k):
            gi = jnp.dot(ea, params['wih'][k]) + params['bih'][k]
            gh = jnp.dot(ht, params['whh'][k]) + params['bhh'][k]
            return gi, gh

        gi_r, gh_r = gate(0)
        gi_z, gh_z = gate(1)
        gi_n, gh_n = gate(2)
        r = jax.nn.sigmoid(gi_r + gh_r)
        z = jax.nn.sigmoid(gi_z + gh_z)
        n = jnp.tanh(gi_n + r * gh_n)
        h_gru = (1.0 - z) * n + z * ht
        h_next = jnp.where(mask[:, None, None], h_gru, ht)
        ht = h_next
        y = jnp.dot(h_next, params['wp'])[..., 0] + params['bp'][0, 0]   # [B, C]
        y = jnp.where(mask[:, None], jax.nn.sigmoid(y), y)
        if i < S - 1:
            qn = questions[:, i + 1]
            yq = y[arangeB, jnp.clip(qn, 0, C - 1)]
            preds.append(jnp.where(qn != -1, yq, 0.0))
    return jnp.stack(preds, axis=1)


# ------------------------------------------------------------------------------ main
if __name__ == "__main__":
    C, H, E, R = 16, 32, 32, 12     # concept_num, hidden_dim, embedding_dim, res_len
    B, S = 2, 8

    key = jax.random.PRNGKey(0)
    kp, kf, kq = jax.random.split(key, 3)
    params = init_params(kp, C, H, E, R)

    questions = jax.random.randint(kq, (B, S), 0, C)
    questions = questions.at[1, S - 2:].set(-1)        # exercise padded steps
    features = jax.random.randint(kf, (B, S), 0, R)

    fwd = jax.jit(functools.partial(gkt_forward, C=C, H=H, E=E, R=R))
    pred = fwd(params, features, questions)
    jax.block_until_ready(pred)
    assert pred.shape == (B, S - 1)
    assert bool(jnp.all(jnp.isfinite(pred)))

    # correctness check against a plain-JAX f32 reference (kernel uses bf16 matmuls,
    # so tolerance is loose)
    ref = gkt_reference(params, features, questions, C=C, H=H, E=E, R=R)
    max_diff = float(jnp.max(jnp.abs(pred - ref)))
    assert max_diff < 0.15, f"kernel vs reference mismatch: max |diff| = {max_diff}"
    print("KERNEL_OK")
</pallas_src>

<mosaic_0001>
module attributes {stable_mosaic.version = 11 : i64} {
  func.func @_gkt_fused_kernel(%arg0: i32, %arg1: i32, %arg2: memref<2x8xi32, #tpu.memory_space<smem>>, %arg3: memref<2x8xi32, #tpu.memory_space<smem>>, %arg4: memref<8xi32, #tpu.memory_space<smem>>, %arg5: memref<192x32xf32, #tpu.memory_space<vmem>>, %arg6: memref<16x32xf32, #tpu.memory_space<vmem>>, %arg7: memref<16x16xf32, #tpu.memory_space<vmem>>, %arg8: memref<16x16xf32, #tpu.memory_space<vmem>>, %arg9: memref<64x96xbf16, #tpu.memory_space<vmem>>, %arg10: memref<1x32xf32, #tpu.memory_space<vmem>>, %arg11: memref<32x32xbf16, #tpu.memory_space<vmem>>, %arg12: memref<1x32xf32, #tpu.memory_space<vmem>>, %arg13: memref<64x160xbf16, #tpu.memory_space<vmem>>, %arg14: memref<1x64xf32, #tpu.memory_space<vmem>>, %arg15: memref<64x64xbf16, #tpu.memory_space<vmem>>, %arg16: memref<1x64xf32, #tpu.memory_space<vmem>>, %arg17: memref<32x64xbf16, #tpu.memory_space<vmem>>, %arg18: memref<1x64xf32, #tpu.memory_space<vmem>>, %arg19: memref<32x32xf32, #tpu.memory_space<vmem>>, %arg20: memref<32x96xbf16, #tpu.memory_space<vmem>>, %arg21: memref<1x96xf32, #tpu.memory_space<vmem>>, %arg22: memref<1x96xf32, #tpu.memory_space<vmem>>, %arg23: memref<1x32xf32, #tpu.memory_space<vmem>>, %arg24: memref<1x1xf32, #tpu.memory_space<vmem>>, %arg25: memref<2x7xf32, #tpu.memory_space<vmem>>, %arg26: memref<32x32xf32, #tpu.memory_space<vmem>>) attributes {dimension_semantics = [#tpu.dimension_semantics<parallel>, #tpu.dimension_semantics<arbitrary>], iteration_bounds = array<i64: 1, 7>, scalar_prefetch = 3 : i64, scratch_operands = 1 : i64, tpu.core_type = #tpu.core_type<tc>, window_params = [{pipeline_mode = #tpu.pipeline_mode<synchronous>, transform_indices = @transform_0, window_bounds = array<i64: 192, 32>}, {pipeline_mode = #tpu.pipeline_mode<synchronous>, transform_indices = @transform_1, window_bounds = array<i64: 16, 32>}, {pipeline_mode = #tpu.pipeline_mode<synchronous>, transform_indices = @transform_2, window_bounds = array<i64: 16, 16>}, {pipeline_mode = #tpu.pipeline_mode<synchronous>, transform_indices = @transform_3, window_bounds = array<i64: 16, 16>}, {pipeline_mode = #tpu.pipeline_mode<synchronous>, transform_indices = @transform_4, window_bounds = array<i64: 64, 96>}, {pipeline_mode = #tpu.pipeline_mode<synchronous>, transform_indices = @transform_5, window_bounds = array<i64: 1, 32>}, {pipeline_mode = #tpu.pipeline_mode<synchronous>, transform_indices = @transform_6, window_bounds = array<i64: 32, 32>}, {pipeline_mode = #tpu.pipeline_mode<synchronous>, transform_indices = @transform_7, window_bounds = array<i64: 1, 32>}, {pipeline_mode = #tpu.pipeline_mode<synchronous>, transform_indices = @transform_8, window_bounds = array<i64: 64, 160>}, {pipeline_mode = #tpu.pipeline_mode<synchronous>, transform_indices = @transform_9, window_bounds = array<i64: 1, 64>}, {pipeline_mode = #tpu.pipeline_mode<synchronous>, transform_indices = @transform_10, window_bounds = array<i64: 64, 64>}, {pipeline_mode = #tpu.pipeline_mode<synchronous>, transform_indices = @transform_11, window_bounds = array<i64: 1, 64>}, {pipeline_mode = #tpu.pipeline_mode<synchronous>, transform_indices = @transform_12, window_bounds = array<i64: 32, 64>}, {pipeline_mode = #tpu.pipeline_mode<synchronous>, transform_indices = @transform_13, window_bounds = array<i64: 1, 64>}, {pipeline_mode = #tpu.pipeline_mode<synchronous>, transform_indices = @transform_14, window_bounds = array<i64: 32, 32>}, {pipeline_mode = #tpu.pipeline_mode<synchronous>, transform_indices = @transform_15, window_bounds = array<i64: 32, 96>}, {pipeline_mode = #tpu.pipeline_mode<synchronous>, transform_indices = @transform_16, window_bounds = array<i64: 1, 96>}, {pipeline_mode = #tpu.pipeline_mode<synchronous>, transform_indices = @transform_17, window_bounds = array<i64: 1, 96>}, {pipeline_mode = #tpu.pipeline_mode<synchronous>, transform_indices = @transform_18, window_bounds = array<i64: 1, 32>}, {pipeline_mode = #tpu.pipeline_mode<synchronous>, transform_indices = @transform_19, window_bounds = array<i64: 1, 1>}, {transform_indices = @transform_20, window_bounds = array<i64: 2, 7>}]} {
    %c2_i32 = arith.constant 2 : i32
    %0 = arith.muli %arg0, %c2_i32 : i32
    %c0_i32 = arith.constant 0 : i32
    %1 = arith.cmpi eq, %arg1, %c0_i32 : i32
    %2 = arith.extui %1 : i1 to i32
    %c0_i32_0 = arith.constant 0 : i32
    %3 = arith.cmpi ne, %2, %c0_i32_0 : i32
    scf.if %3 {
      %cst_101 = arith.constant 0.000000e+00 : f32
      %300 = vector.broadcast %cst_101 : f32 to vector<32x32xf32>
      %c0_102 = arith.constant 0 : index
      %c0_103 = arith.constant 0 : index
      %301 = vector.load %arg26[%c0_102, %c0_103] : memref<32x32xf32, #tpu.memory_space<vmem>>, vector<32x32xf32>
      tpu.vector_store %arg26[%c0_102, %c0_103], %300 {strides = array<i32>} : memref<32x32xf32, #tpu.memory_space<vmem>>, vector<32x32xf32>,
      %cst_104 = arith.constant 0.000000e+00 : f32
      %302 = vector.broadcast %cst_104 : f32 to vector<2x7xf32>
      %c0_105 = arith.constant 0 : index
      %c0_106 = arith.constant 0 : index
      %303 = vector.load %arg25[%c0_105, %c0_106] : memref<2x7xf32, #tpu.memory_space<vmem>>, vector<2x7xf32>
      tpu.vector_store %arg25[%c0_105, %c0_106], %302 {strides = array<i32>} : memref<2x7xf32, #tpu.memory_space<vmem>>, vector<2x7xf32>,
    } else {
    }
    %4 = arith.index_cast %arg1 : i32 to index
    %5 = memref.load %arg4[%4] : memref<8xi32, #tpu.memory_space<smem>>
    %c1_i32 = arith.constant 1 : i32
    %6 = arith.cmpi eq, %5, %c1_i32 : i32
    %cst = arith.constant 1.000000e+00 : f32
    %cst_1 = arith.constant 0.999994993 : f32
    %7 = arith.select %6, %cst, %cst_1 : f32
    %c0 = arith.constant 0 : index
    %c0_2 = arith.constant 0 : index
    %8 = vector.load %arg26[%c0, %c0_2] : memref<32x32xf32, #tpu.memory_space<vmem>>, vector<32x32xf32>
    %c0_3 = arith.constant 0 : index
    %c0_4 = arith.constant 0 : index
    %9 = vector.load %arg6[%c0_3, %c0_4] : memref<16x32xf32, #tpu.memory_space<vmem>>, vector<16x32xf32>
    %c0_5 = arith.constant 0 : index
    %c0_6 = arith.constant 0 : index
    %10 = vector.load %arg7[%c0_5, %c0_6] : memref<16x16xf32, #tpu.memory_space<vmem>>, vector<16x16xf32>
    %c0_7 = arith.constant 0 : index
    %c0_8 = arith.constant 0 : index
    %11 = vector.load %arg8[%c0_7, %c0_8] : memref<16x16xf32, #tpu.memory_space<vmem>>, vector<16x16xf32>
    %12 = tpu.iota {dimensions = array<i32: 0>} : vector<16x1xi32>
    %13 = tpu.iota {dimensions = array<i32: 1>} : vector<1x16xi32>
    %c0_i32_9 = arith.constant 0 : i32
    %14 = arith.addi %0, %c0_i32_9 : i32
    %15 = arith.index_cast %14 : i32 to index
    %16 = arith.index_cast %arg1 : i32 to index
    %17 = memref.load %arg2[%15, %16] : memref<2x8xi32, #tpu.memory_space<smem>>
    %c-1_i32 = arith.constant -1 : i32
    %18 = arith.cmpi ne, %17, %c-1_i32 : i32
    %19 = arith.extui %18 : i1 to i32
    %20 = arith.sitofp %19 : i32 to f32
    %c0_i32_10 = arith.constant 0 : i32
    %21 = arith.select %18, %17, %c0_i32_10 : i32
    %c0_i32_11 = arith.constant 0 : i32
    %22 = arith.addi %0, %c0_i32_11 : i32
    %23 = arith.index_cast %22 : i32 to index
    %24 = arith.index_cast %arg1 : i32 to index
    %25 = memref.load %arg3[%23, %24] : memref<2x8xi32, #tpu.memory_space<smem>>
    %c191_i32 = arith.constant 191 : i32
    %26 = arith.minsi %25, %c191_i32 : i32
    %27 = vector.broadcast %21 : i32 to vector<16x1xi32>
    %28 = arith.cmpi eq, %12, %27 : vector<16x1xi32>
    %29 = arith.extui %28 : vector<16x1xi1> to vector<16x1xi32>
    %30 = arith.sitofp %29 : vector<16x1xi32> to vector<16x1xf32>
    %31 = vector.broadcast %21 : i32 to vector<1x16xi32>
    %32 = arith.cmpi eq, %13, %31 : vector<1x16xi32>
    %33 = arith.extui %32 : vector<1x16xi1> to vector<1x16xi32>
    %34 = arith.sitofp %33 : vector<1x16xi32> to vector<1x16xf32>
    %35 = arith.index_cast %26 : i32 to index
    %c0_12 = arith.constant 0 : index
    %36 = vector.load %arg5[%35, %c0_12] : memref<192x32xf32, #tpu.memory_space<vmem>>, vector<1x32xf32>
    %37 = vector.broadcast %30 : vector<16x1xf32> to vector<16x32xf32>
    %38 = vector.broadcast %36 : vector<1x32xf32> to vector<16x32xf32>
    %39 = arith.mulf %37, %38 : vector<16x32xf32>
    %cst_13 = arith.constant 1.000000e+00 : f32
    %40 = vector.broadcast %cst_13 : f32 to vector<16x1xf32>
    %41 = arith.subf %40, %30 : vector<16x1xf32>
    %42 = vector.broadcast %41 : vector<16x1xf32> to vector<16x32xf32>
    %43 = arith.mulf %42, %9 : vector<16x32xf32>
    %44 = arith.addf %39, %43 : vector<16x32xf32>
    %45 = vector.broadcast %20 : f32 to vector<16x32xf32>
    %46 = arith.mulf %45, %44 : vector<16x32xf32>
    %47 = vector.broadcast %34 : vector<1x16xf32> to vector<16x16xf32>
    %48 = arith.mulf %11, %47 : vector<16x16xf32>
    %cst_14 = arith.constant dense<0.000000e+00> : vector<16xf32>
    %49 = vector.multi_reduction <add>, %48, %cst_14 [1] : vector<16x16xf32> to vector<16xf32>
    %50 = vector.shape_cast %49 : vector<16xf32> to vector<16x1xf32>
    %51 = vector.broadcast %34 : vector<1x16xf32> to vector<16x16xf32>
    %52 = arith.mulf %10, %51 : vector<16x16xf32>
    %cst_15 = arith.constant dense<0.000000e+00> : vector<16xf32>
    %53 = vector.multi_reduction <add>, %52, %cst_15 [1] : vector<16x16xf32> to vector<16xf32>
    %54 = vector.shape_cast %53 : vector<16xf32> to vector<16x1xf32>
    %c0_i32_16 = arith.constant 0 : i32
    %55 = arith.addi %c0_i32_16, %21 : i32
    %56 = arith.index_cast %55 : i32 to index
    %c0_17 = arith.constant 0 : index
    %57 = vector.load %arg26[%56, %c0_17] : memref<32x32xf32, #tpu.memory_space<vmem>>, vector<1x32xf32>
    %58 = vector.broadcast %20 : f32 to vector<16x1xf32>
    %c1_i32_18 = arith.constant 1 : i32
    %59 = arith.addi %0, %c1_i32_18 : i32
    %60 = arith.index_cast %59 : i32 to index
    %61 = arith.index_cast %arg1 : i32 to index
    %62 = memref.load %arg2[%60, %61] : memref<2x8xi32, #tpu.memory_space<smem>>
    %c-1_i32_19 = arith.constant -1 : i32
    %63 = arith.cmpi ne, %62, %c-1_i32_19 : i32
    %64 = arith.extui %63 : i1 to i32
    %65 = arith.sitofp %64 : i32 to f32
    %c0_i32_20 = arith.constant 0 : i32
    %66 = arith.select %63, %62, %c0_i32_20 : i32
    %c1_i32_21 = arith.constant 1 : i32
    %67 = arith.addi %0, %c1_i32_21 : i32
    %68 = arith.index_cast %67 : i32 to index
    %69 = arith.index_cast %arg1 : i32 to index
    %70 = memref.load %arg3[%68, %69] : memref<2x8xi32, #tpu.memory_space<smem>>
    %c191_i32_22 = arith.constant 191 : i32
    %71 = arith.minsi %70, %c191_i32_22 : i32
    %72 = vector.broadcast %66 : i32 to vector<16x1xi32>
    %73 = arith.cmpi eq, %12, %72 : vector<16x1xi32>
    %74 = arith.extui %73 : vector<16x1xi1> to vector<16x1xi32>
    %75 = arith.sitofp %74 : vector<16x1xi32> to vector<16x1xf32>
    %76 = vector.broadcast %66 : i32 to vector<1x16xi32>
    %77 = arith.cmpi eq, %13, %76 : vector<1x16xi32>
    %78 = arith.extui %77 : vector<1x16xi1> to vector<1x16xi32>
    %79 = arith.sitofp %78 : vector<1x16xi32> to vector<1x16xf32>
    %80 = arith.index_cast %71 : i32 to index
    %c0_23 = arith.constant 0 : index
    %81 = vector.load %arg5[%80, %c0_23] : memref<192x32xf32, #tpu.memory_space<vmem>>, vector<1x32xf32>
    %82 = vector.broadcast %75 : vector<16x1xf32> to vector<16x32xf32>
    %83 = vector.broadcast %81 : vector<1x32xf32> to vector<16x32xf32>
    %84 = arith.mulf %82, %83 : vector<16x32xf32>
    %cst_24 = arith.constant 1.000000e+00 : f32
    %85 = vector.broadcast %cst_24 : f32 to vector<16x1xf32>
    %86 = arith.subf %85, %75 : vector<16x1xf32>
    %87 = vector.broadcast %86 : vector<16x1xf32> to vector<16x32xf32>
    %88 = arith.mulf %87, %9 : vector<16x32xf32>
    %89 = arith.addf %84, %88 : vector<16x32xf32>
    %90 = vector.broadcast %65 : f32 to vector<16x32xf32>
    %91 = arith.mulf %90, %89 : vector<16x32xf32>
    %92 = vector.broadcast %79 : vector<1x16xf32> to vector<16x16xf32>
    %93 = arith.mulf %11, %92 : vector<16x16xf32>
    %cst_25 = arith.constant dense<0.000000e+00> : vector<16xf32>
    %94 = vector.multi_reduction <add>, %93, %cst_25 [1] : vector<16x16xf32> to vector<16xf32>
    %95 = vector.shape_cast %94 : vector<16xf32> to vector<16x1xf32>
    %96 = vector.broadcast %79 : vector<1x16xf32> to vector<16x16xf32>
    %97 = arith.mulf %10, %96 : vector<16x16xf32>
    %cst_26 = arith.constant dense<0.000000e+00> : vector<16xf32>
    %98 = vector.multi_reduction <add>, %97, %cst_26 [1] : vector<16x16xf32> to vector<16xf32>
    %99 = vector.shape_cast %98 : vector<16xf32> to vector<16x1xf32>
    %c16_i32 = arith.constant 16 : i32
    %100 = arith.addi %c16_i32, %66 : i32
    %101 = arith.index_cast %100 : i32 to index
    %c0_27 = arith.constant 0 : index
    %102 = vector.load %arg26[%101, %c0_27] : memref<32x32xf32, #tpu.memory_space<vmem>>, vector<1x32xf32>
    %103 = vector.broadcast %65 : f32 to vector<16x1xf32>
    %104 = tpu.concatenate %46, %91 in 0 : vector<16x32xf32>, vector<16x32xf32> -> vector<32x32xf32>
    %105 = tpu.concatenate %50, %95 in 0 : vector<16x1xf32>, vector<16x1xf32> -> vector<32x1xf32>
    %106 = tpu.concatenate %54, %99 in 0 : vector<16x1xf32>, vector<16x1xf32> -> vector<32x1xf32>
    %107 = tpu.concatenate %30, %75 in 0 : vector<16x1xf32>, vector<16x1xf32> -> vector<32x1xf32>
    %108 = tpu.concatenate %58, %103 in 0 : vector<16x1xf32>, vector<16x1xf32> -> vector<32x1xf32>
    %109 = tpu.concatenate %57, %102 in 0 : vector<1x32xf32>, vector<1x32xf32> -> vector<2x32xf32>
    %110 = tpu.concatenate %36, %81 in 0 : vector<1x32xf32>, vector<1x32xf32> -> vector<2x32xf32>
    %111 = tpu.concatenate %109, %110 in 1 : vector<2x32xf32>, vector<2x32xf32> -> vector<2x64xf32>
    %112 = arith.truncf %111 : vector<2x64xf32> to vector<2x64xbf16>
    %c0_28 = arith.constant 0 : index
    %c0_29 = arith.constant 0 : index
    %113 = vector.load %arg9[%c0_28, %c0_29] : memref<64x96xbf16, #tpu.memory_space<vmem>>, vector<64x96xbf16>
    %cst_30 = arith.constant dense<0.000000e+00> : vector<2x96xf32>
    %114 = tpu.matmul %112, %113, %cst_30 {dimension_numbers = #tpu.dot_dimension_numbers<[1], [0], [0], [1], [0, 0, 1, 1], [], []>} : vector<2x64xbf16>, vector<64x96xbf16>, vector<2x96xf32> -> vector<2x96xf32>
    %115 = vector.extract_strided_slice %114 {offsets = [0, 0], sizes = [2, 32], strides = [1, 1]} : vector<2x96xf32> to vector<2x32xf32>
    %c0_31 = arith.constant 0 : index
    %c0_32 = arith.constant 0 : index
    %116 = vector.load %arg10[%c0_31, %c0_32] : memref<1x32xf32, #tpu.memory_space<vmem>>, vector<1x32xf32>
    %117 = vector.broadcast %116 : vector<1x32xf32> to vector<2x32xf32>
    %118 = arith.addf %115, %117 : vector<2x32xf32>
    %cst_33 = arith.constant 0.000000e+00 : f32
    %119 = vector.broadcast %cst_33 : f32 to vector<2x32xf32>
    %120 = arith.maximumf %118, %119 : vector<2x32xf32>
    %121 = arith.truncf %120 : vector<2x32xf32> to vector<2x32xbf16>
    %c0_34 = arith.constant 0 : index
    %c0_35 = arith.constant 0 : index
    %122 = vector.load %arg11[%c0_34, %c0_35] : memref<32x32xbf16, #tpu.memory_space<vmem>>, vector<32x32xbf16>
    %cst_36 = arith.constant dense<0.000000e+00> : vector<2x32xf32>
    %123 = tpu.matmul %121, %122, %cst_36 {dimension_numbers = #tpu.dot_dimension_numbers<[1], [0], [0], [1], [0, 0, 1, 1], [], []>} : vector<2x32xbf16>, vector<32x32xbf16>, vector<2x32xf32> -> vector<2x32xf32>
    %c0_37 = arith.constant 0 : index
    %c0_38 = arith.constant 0 : index
    %124 = vector.load %arg12[%c0_37, %c0_38] : memref<1x32xf32, #tpu.memory_space<vmem>>, vector<1x32xf32>
    %125 = vector.broadcast %124 : vector<1x32xf32> to vector<2x32xf32>
    %126 = arith.addf %123, %125 : vector<2x32xf32>
    %cst_39 = arith.constant 0.000000e+00 : f32
    %127 = vector.broadcast %cst_39 : f32 to vector<2x32xf32>
    %128 = arith.maximumf %126, %127 : vector<2x32xf32>
    %129 = vector.broadcast %7 : f32 to vector<2x32xf32>
    %130 = arith.mulf %128, %129 : vector<2x32xf32>
    %131 = vector.extract_strided_slice %114 {offsets = [0, 32], sizes = [2, 64], strides = [1, 1]} : vector<2x96xf32> to vector<2x64xf32>
    %132 = tpu.concatenate %8, %104 in 1 : vector<32x32xf32>, vector<32x32xf32> -> vector<32x64xf32>
    %133 = arith.truncf %132 : vector<32x64xf32> to vector<32x64xbf16>
    %c0_40 = arith.constant 0 : index
    %c0_41 = arith.constant 0 : index
    %134 = vector.load %arg13[%c0_40, %c0_41] : memref<64x160xbf16, #tpu.memory_space<vmem>>, vector<64x160xbf16>
    %cst_42 = arith.constant dense<0.000000e+00> : vector<32x160xf32>
    %135 = tpu.matmul %133, %134, %cst_42 {dimension_numbers = #tpu.dot_dimension_numbers<[1], [0], [0], [1], [0, 0, 1, 1], [], []>} : vector<32x64xbf16>, vector<64x160xbf16>, vector<32x160xf32> -> vector<32x160xf32>
    %136 = vector.extract_strided_slice %135 {offsets = [0, 0], sizes = [32, 64], strides = [1, 1]} : vector<32x160xf32> to vector<32x64xf32>
    %137 = vector.extract_strided_slice %135 {offsets = [0, 64], sizes = [32, 96], strides = [1, 1]} : vector<32x160xf32> to vector<32x96xf32>
    %c0_43 = arith.constant 0 : index
    %c0_44 = arith.constant 0 : index
    %138 = vector.load %arg22[%c0_43, %c0_44] : memref<1x96xf32, #tpu.memory_space<vmem>>, vector<1x96xf32>
    %139 = vector.broadcast %138 : vector<1x96xf32> to vector<32x96xf32>
    %140 = arith.addf %137, %139 : vector<32x96xf32>
    %141 = vector.extract_strided_slice %131 {offsets = [0, 0], sizes = [1, 64], strides = [1, 1]} : vector<2x64xf32> to vector<1x64xf32>
    %142 = vector.shape_cast %141 : vector<1x64xf32> to vector<1x64xf32>
    %143 = vector.broadcast %142 : vector<1x64xf32> to vector<16x64xf32>
    %144 = vector.extract_strided_slice %131 {offsets = [1, 0], sizes = [1, 64], strides = [1, 1]} : vector<2x64xf32> to vector<1x64xf32>
    %145 = vector.shape_cast %144 : vector<1x64xf32> to vector<1x64xf32>
    %146 = vector.broadcast %145 : vector<1x64xf32> to vector<16x64xf32>
    %147 = tpu.concatenate %143, %146 in 0 : vector<16x64xf32>, vector<16x64xf32> -> vector<32x64xf32>
    %148 = arith.addf %136, %147 : vector<32x64xf32>
    %c0_45 = arith.constant 0 : index
    %c0_46 = arith.constant 0 : index
    %149 = vector.load %arg14[%c0_45, %c0_46] : memref<1x64xf32, #tpu.memory_space<vmem>>, vector<1x64xf32>
    %150 = vector.broadcast %149 : vector<1x64xf32> to vector<32x64xf32>
    %151 = arith.addf %148, %150 : vector<32x64xf32>
    %cst_47 = arith.constant 0.000000e+00 : f32
    %152 = vector.broadcast %cst_47 : f32 to vector<32x64xf32>
    %153 = arith.maximumf %151, %152 : vector<32x64xf32>
    %154 = arith.truncf %153 : vector<32x64xf32> to vector<32x64xbf16>
    %c0_48 = arith.constant 0 : index
    %c0_49 = arith.constant 0 : index
    %155 = vector.load %arg15[%c0_48, %c0_49] : memref<64x64xbf16, #tpu.memory_space<vmem>>, vector<64x64xbf16>
    %cst_50 = arith.constant dense<0.000000e+00> : vector<32x64xf32>
    %156 = tpu.matmul %154, %155, %cst_50 {dimension_numbers = #tpu.dot_dimension_numbers<[1], [0], [0], [1], [0, 0, 1, 1], [], []>} : vector<32x64xbf16>, vector<64x64xbf16>, vector<32x64xf32> -> vector<32x64xf32>
    %c0_51 = arith.constant 0 : index
    %c0_52 = arith.constant 0 : index
    %157 = vector.load %arg16[%c0_51, %c0_52] : memref<1x64xf32, #tpu.memory_space<vmem>>, vector<1x64xf32>
    %158 = vector.broadcast %157 : vector<1x64xf32> to vector<32x64xf32>
    %159 = arith.addf %156, %158 : vector<32x64xf32>
    %cst_53 = arith.constant 0.000000e+00 : f32
    %160 = vector.broadcast %cst_53 : f32 to vector<32x64xf32>
    %161 = arith.maximumf %159, %160 : vector<32x64xf32>
    %cst_54 = arith.constant 0.999994993 : f32
    %162 = vector.broadcast %cst_54 : f32 to vector<32x64xf32>
    %163 = arith.mulf %161, %162 : vector<32x64xf32>
    %164 = vector.extract_strided_slice %163 {offsets = [0, 0], sizes = [32, 32], strides = [1, 1]} : vector<32x64xf32> to vector<32x32xf32>
    %165 = vector.broadcast %105 : vector<32x1xf32> to vector<32x32xf32>
    %166 = arith.mulf %165, %164 : vector<32x32xf32>
    %167 = vector.extract_strided_slice %163 {offsets = [0, 32], sizes = [32, 32], strides = [1, 1]} : vector<32x64xf32> to vector<32x32xf32>
    %168 = vector.broadcast %106 : vector<32x1xf32> to vector<32x32xf32>
    %169 = arith.mulf %168, %167 : vector<32x32xf32>
    %170 = arith.addf %166, %169 : vector<32x32xf32>
    %171 = vector.extract_strided_slice %130 {offsets = [0, 0], sizes = [1, 32], strides = [1, 1]} : vector<2x32xf32> to vector<1x32xf32>
    %172 = vector.broadcast %30 : vector<16x1xf32> to vector<16x32xf32>
    %173 = vector.broadcast %171 : vector<1x32xf32> to vector<16x32xf32>
    %174 = arith.mulf %172, %173 : vector<16x32xf32>
    %175 = vector.extract_strided_slice %130 {offsets = [1, 0], sizes = [1, 32], strides = [1, 1]} : vector<2x32xf32> to vector<1x32xf32>
    %176 = vector.broadcast %75 : vector<16x1xf32> to vector<16x32xf32>
    %177 = vector.broadcast %175 : vector<1x32xf32> to vector<16x32xf32>
    %178 = arith.mulf %176, %177 : vector<16x32xf32>
    %179 = tpu.concatenate %174, %178 in 0 : vector<16x32xf32>, vector<16x32xf32> -> vector<32x32xf32>
    %cst_55 = arith.constant 1.000000e+00 : f32
    %180 = vector.broadcast %cst_55 : f32 to vector<32x1xf32>
    %181 = arith.subf %180, %107 : vector<32x1xf32>
    %182 = vector.broadcast %181 : vector<32x1xf32> to vector<32x32xf32>
    %183 = arith.mulf %182, %170 : vector<32x32xf32>
    %184 = arith.addf %183, %179 : vector<32x32xf32>
    %185 = arith.truncf %184 : vector<32x32xf32> to vector<32x32xbf16>
    %c0_56 = arith.constant 0 : index
    %c0_57 = arith.constant 0 : index
    %186 = vector.load %arg17[%c0_56, %c0_57] : memref<32x64xbf16, #tpu.memory_space<vmem>>, vector<32x64xbf16>
    %cst_58 = arith.constant dense<0.000000e+00> : vector<32x64xf32>
    %187 = tpu.matmul %185, %186, %cst_58 {dimension_numbers = #tpu.dot_dimension_numbers<[1], [0], [0], [1], [0, 0, 1, 1], [], []>} : vector<32x32xbf16>, vector<32x64xbf16>, vector<32x64xf32> -> vector<32x64xf32>
    %c0_59 = arith.constant 0 : index
    %c0_60 = arith.constant 0 : index
    %188 = vector.load %arg18[%c0_59, %c0_60] : memref<1x64xf32, #tpu.memory_space<vmem>>, vector<1x64xf32>
    %189 = vector.broadcast %188 : vector<1x64xf32> to vector<32x64xf32>
    %190 = arith.addf %187, %189 : vector<32x64xf32>
    %191 = vector.extract_strided_slice %190 {offsets = [0, 0], sizes = [32, 32], strides = [1, 1]} : vector<32x64xf32> to vector<32x32xf32>
    %192 = arith.negf %191 : vector<32x32xf32>
    %193 = math.exp %192 : vector<32x32xf32>
    %cst_61 = arith.constant 1.000000e+00 : f32
    %194 = vector.broadcast %cst_61 : f32 to vector<32x32xf32>
    %195 = arith.addf %194, %193 : vector<32x32xf32>
    %196 = arith.divf %194, %195 : vector<32x32xf32>
    %197 = vector.extract_strided_slice %190 {offsets = [0, 32], sizes = [32, 32], strides = [1, 1]} : vector<32x64xf32> to vector<32x32xf32>
    %198 = math.tanh %197 : vector<32x32xf32>
    %c0_62 = arith.constant 0 : index
    %c0_63 = arith.constant 0 : index
    %199 = vector.load %arg19[%c0_62, %c0_63] : memref<32x32xf32, #tpu.memory_space<vmem>>, vector<32x32xf32>
    %200 = arith.mulf %199, %196 : vector<32x32xf32>
    %201 = arith.mulf %200, %184 : vector<32x32xf32>
    %202 = arith.subf %184, %201 : vector<32x32xf32>
    %203 = arith.mulf %199, %198 : vector<32x32xf32>
    %204 = arith.addf %202, %203 : vector<32x32xf32>
    %205 = arith.truncf %204 : vector<32x32xf32> to vector<32x32xbf16>
    %c0_64 = arith.constant 0 : index
    %c0_65 = arith.constant 0 : index
    %206 = vector.load %arg20[%c0_64, %c0_65] : memref<32x96xbf16, #tpu.memory_space<vmem>>, vector<32x96xbf16>
    %cst_66 = arith.constant dense<0.000000e+00> : vector<32x96xf32>
    %207 = tpu.matmul %205, %206, %cst_66 {dimension_numbers = #tpu.dot_dimension_numbers<[1], [0], [0], [1], [0, 0, 1, 1], [], []>} : vector<32x32xbf16>, vector<32x96xbf16>, vector<32x96xf32> -> vector<32x96xf32>
    %c0_67 = arith.constant 0 : index
    %c0_68 = arith.constant 0 : index
    %208 = vector.load %arg21[%c0_67, %c0_68] : memref<1x96xf32, #tpu.memory_space<vmem>>, vector<1x96xf32>
    %209 = vector.broadcast %208 : vector<1x96xf32> to vector<32x96xf32>
    %210 = arith.addf %207, %209 : vector<32x96xf32>
    %211 = vector.extract_strided_slice %210 {offsets = [0, 0], sizes = [32, 32], strides = [1, 1]} : vector<32x96xf32> to vector<32x32xf32>
    %212 = vector.extract_strided_slice %140 {offsets = [0, 0], sizes = [32, 32], strides = [1, 1]} : vector<32x96xf32> to vector<32x32xf32>
    %213 = arith.addf %211, %212 : vector<32x32xf32>
    %214 = arith.negf %213 : vector<32x32xf32>
    %215 = math.exp %214 : vector<32x32xf32>
    %cst_69 = arith.constant 1.000000e+00 : f32
    %216 = vector.broadcast %cst_69 : f32 to vector<32x32xf32>
    %217 = arith.addf %216, %215 : vector<32x32xf32>
    %218 = arith.divf %216, %217 : vector<32x32xf32>
    %219 = vector.extract_strided_slice %210 {offsets = [0, 32], sizes = [32, 32], strides = [1, 1]} : vector<32x96xf32> to vector<32x32xf32>
    %220 = vector.extract_strided_slice %140 {offsets = [0, 32], sizes = [32, 32], strides = [1, 1]} : vector<32x96xf32> to vector<32x32xf32>
    %221 = arith.addf %219, %220 : vector<32x32xf32>
    %222 = arith.negf %221 : vector<32x32xf32>
    %223 = math.exp %222 : vector<32x32xf32>
    %cst_70 = arith.constant 1.000000e+00 : f32
    %224 = vector.broadcast %cst_70 : f32 to vector<32x32xf32>
    %225 = arith.addf %224, %223 : vector<32x32xf32>
    %226 = arith.divf %224, %225 : vector<32x32xf32>
    %227 = vector.extract_strided_slice %210 {offsets = [0, 64], sizes = [32, 32], strides = [1, 1]} : vector<32x96xf32> to vector<32x32xf32>
    %228 = vector.extract_strided_slice %140 {offsets = [0, 64], sizes = [32, 32], strides = [1, 1]} : vector<32x96xf32> to vector<32x32xf32>
    %229 = arith.mulf %218, %228 : vector<32x32xf32>
    %230 = arith.addf %227, %229 : vector<32x32xf32>
    %231 = math.tanh %230 : vector<32x32xf32>
    %cst_71 = arith.constant 1.000000e+00 : f32
    %232 = vector.broadcast %cst_71 : f32 to vector<32x32xf32>
    %233 = arith.subf %232, %226 : vector<32x32xf32>
    %234 = arith.mulf %233, %231 : vector<32x32xf32>
    %235 = arith.mulf %226, %8 : vector<32x32xf32>
    %236 = arith.addf %234, %235 : vector<32x32xf32>
    %237 = vector.broadcast %108 : vector<32x1xf32> to vector<32x32xf32>
    %238 = arith.mulf %237, %236 : vector<32x32xf32>
    %cst_72 = arith.constant 1.000000e+00 : f32
    %239 = vector.broadcast %cst_72 : f32 to vector<32x1xf32>
    %240 = arith.subf %239, %108 : vector<32x1xf32>
    %241 = vector.broadcast %240 : vector<32x1xf32> to vector<32x32xf32>
    %242 = arith.mulf %241, %8 : vector<32x32xf32>
    %243 = arith.addf %238, %242 : vector<32x32xf32>
    %c0_73 = arith.constant 0 : index
    %c0_74 = arith.constant 0 : index
    %244 = vector.load %arg26[%c0_73, %c0_74] : memref<32x32xf32, #tpu.memory_space<vmem>>, vector<32x32xf32>
    tpu.vector_store %arg26[%c0_73, %c0_74], %243 {strides = array<i32>} : memref<32x32xf32, #tpu.memory_space<vmem>>, vector<32x32xf32>,
    %c0_75 = arith.constant 0 : index
    %c0_76 = arith.constant 0 : index
    %245 = vector.load %arg23[%c0_75, %c0_76] : memref<1x32xf32, #tpu.memory_space<vmem>>, vector<1x32xf32>
    %c0_77 = arith.constant 0 : index
    %c0_78 = arith.constant 0 : index
    %246 = vector.load %arg24[%c0_77, %c0_78] : memref<1x1xf32, #tpu.memory_space<vmem>>, vector<1x1xf32>
    %c0_i32_79 = arith.constant 0 : i32
    %247 = arith.addi %0, %c0_i32_79 : i32
    %c1_i32_80 = arith.constant 1 : i32
    %248 = arith.addi %arg1, %c1_i32_80 : i32
    %249 = arith.index_cast %247 : i32 to index
    %250 = arith.index_cast %248 : i32 to index
    %251 = memref.load %arg2[%249, %250] : memref<2x8xi32, #tpu.memory_space<smem>>
    %c-1_i32_81 = arith.constant -1 : i32
    %252 = arith.cmpi ne, %251, %c-1_i32_81 : i32
    %c0_i32_82 = arith.constant 0 : i32
    %253 = arith.select %252, %251, %c0_i32_82 : i32
    %c0_i32_83 = arith.constant 0 : i32
    %254 = arith.addi %c0_i32_83, %253 : i32
    %255 = arith.index_cast %254 : i32 to index
    %c0_84 = arith.constant 0 : index
    %256 = vector.load %arg26[%255, %c0_84] : memref<32x32xf32, #tpu.memory_space<vmem>>, vector<1x32xf32>
    %257 = arith.mulf %256, %245 : vector<1x32xf32>
    %cst_85 = arith.constant dense<0.000000e+00> : vector<1xf32>
    %258 = vector.multi_reduction <add>, %257, %cst_85 [1] : vector<1x32xf32> to vector<1xf32>
    %259 = vector.shape_cast %258 : vector<1xf32> to vector<1x1xf32>
    %260 = arith.addf %259, %246 : vector<1x1xf32>
    %261 = arith.negf %260 : vector<1x1xf32>
    %262 = math.exp %261 : vector<1x1xf32>
    %cst_86 = arith.constant 1.000000e+00 : f32
    %263 = vector.broadcast %cst_86 : f32 to vector<1x1xf32>
    %264 = arith.addf %263, %262 : vector<1x1xf32>
    %265 = arith.divf %263, %264 : vector<1x1xf32>
    %266 = arith.select %18, %265, %260 : vector<1x1xf32>
    %cst_87 = arith.constant 0.000000e+00 : f32
    %267 = vector.broadcast %cst_87 : f32 to vector<1x1xf32>
    %268 = arith.select %252, %266, %267 : vector<1x1xf32>
    %c1_i32_88 = arith.constant 1 : i32
    %269 = arith.addi %0, %c1_i32_88 : i32
    %c1_i32_89 = arith.constant 1 : i32
    %270 = arith.addi %arg1, %c1_i32_89 : i32
    %271 = arith.index_cast %269 : i32 to index
    %272 = arith.index_cast %270 : i32 to index
    %273 = memref.load %arg2[%271, %272] : memref<2x8xi32, #tpu.memory_space<smem>>
    %c-1_i32_90 = arith.constant -1 : i32
    %274 = arith.cmpi ne, %273, %c-1_i32_90 : i32
    %c0_i32_91 = arith.constant 0 : i32
    %275 = arith.select %274, %273, %c0_i32_91 : i32
    %c16_i32_92 = arith.constant 16 : i32
    %276 = arith.addi %c16_i32_92, %275 : i32
    %277 = arith.index_cast %276 : i32 to index
    %c0_93 = arith.constant 0 : index
    %278 = vector.load %arg26[%277, %c0_93] : memref<32x32xf32, #tpu.memory_space<vmem>>, vector<1x32xf32>
    %279 = arith.mulf %278, %245 : vector<1x32xf32>
    %cst_94 = arith.constant dense<0.000000e+00> : vector<1xf32>
    %280 = vector.multi_reduction <add>, %279, %cst_94 [1] : vector<1x32xf32> to vector<1xf32>
    %281 = vector.shape_cast %280 : vector<1xf32> to vector<1x1xf32>
    %282 = arith.addf %281, %246 : vector<1x1xf32>
    %283 = arith.negf %282 : vector<1x1xf32>
    %284 = math.exp %283 : vector<1x1xf32>
    %cst_95 = arith.constant 1.000000e+00 : f32
    %285 = vector.broadcast %cst_95 : f32 to vector<1x1xf32>
    %286 = arith.addf %285, %284 : vector<1x1xf32>
    %287 = arith.divf %285, %286 : vector<1x1xf32>
    %288 = arith.select %63, %287, %282 : vector<1x1xf32>
    %cst_96 = arith.constant 0.000000e+00 : f32
    %289 = vector.broadcast %cst_96 : f32 to vector<1x1xf32>
    %290 = arith.select %274, %288, %289 : vector<1x1xf32>
    %291 = tpu.concatenate %268, %290 in 0 : vector<1x1xf32>, vector<1x1xf32> -> vector<2x1xf32>
    %292 = tpu.iota {dimensions = array<i32: 1>} : vector<2x7xi32>
    %293 = vector.broadcast %arg1 : i32 to vector<2x7xi32>
    %294 = arith.cmpi eq, %292, %293 : vector<2x7xi32>
    %c0_97 = arith.constant 0 : index
    %c0_98 = arith.constant 0 : index
    %295 = vector.load %arg25[%c0_97, %c0_98] : memref<2x7xf32, #tpu.memory_space<vmem>>, vector<2x7xf32>
    %296 = vector.shape_cast %291 : vector<2x1xf32> to vector<2x1xf32>
    %297 = vector.broadcast %296 : vector<2x1xf32> to vector<2x7xf32>
    %298 = arith.select %294, %297, %295 : vector<2x7xi1>, vector<2x7xf32>
    %c0_99 = arith.constant 0 : index
    %c0_100 = arith.constant 0 : index
    %299 = vector.load %arg25[%c0_99, %c0_100] : memref<2x7xf32, #tpu.memory_space<vmem>>, vector<2x7xf32>
    tpu.vector_store %arg25[%c0_99, %c0_100], %298 {strides = array<i32>} : memref<2x7xf32, #tpu.memory_space<vmem>>, vector<2x7xf32>,
    return
  }
  func.func @transform_0(%arg0: i32, %arg1: i32, %arg2: memref<2x8xi32, #tpu.memory_space<smem>>, %arg3: memref<2x8xi32, #tpu.memory_space<smem>>, %arg4: memref<8xi32, #tpu.memory_space<smem>>) -> (i32, i32) {
    %c0_i32 = arith.constant 0 : i32
    %c0_i32_0 = arith.constant 0 : i32
    %c0_i32_1 = arith.constant 0 : i32
    return %c0_i32, %c0_i32_0 : i32, i32
  }
  func.func @transform_1(%arg0: i32, %arg1: i32, %arg2: memref<2x8xi32, #tpu.memory_space<smem>>, %arg3: memref<2x8xi32, #tpu.memory_space<smem>>, %arg4: memref<8xi32, #tpu.memory_space<smem>>) -> (i32, i32) {
    %c0_i32 = arith.constant 0 : i32
    %c0_i32_0 = arith.constant 0 : i32
    %c0_i32_1 = arith.constant 0 : i32
    return %c0_i32, %c0_i32_0 : i32, i32
  }
  func.func @transform_2(%arg0: i32, %arg1: i32, %arg2: memref<2x8xi32, #tpu.memory_space<smem>>, %arg3: memref<2x8xi32, #tpu.memory_space<smem>>, %arg4: memref<8xi32, #tpu.memory_space<smem>>) -> (i32, i32) {
    %c0_i32 = arith.constant 0 : i32
    %c0_i32_0 = arith.constant 0 : i32
    %c0_i32_1 = arith.constant 0 : i32
    return %c0_i32, %c0_i32_0 : i32, i32
  }
  func.func @transform_3(%arg0: i32, %arg1: i32, %arg2: memref<2x8xi32, #tpu.memory_space<smem>>, %arg3: memref<2x8xi32, #tpu.memory_space<smem>>, %arg4: memref<8xi32, #tpu.memory_space<smem>>) -> (i32, i32) {
    %c0_i32 = arith.constant 0 : i32
    %c0_i32_0 = arith.constant 0 : i32
    %c0_i32_1 = arith.constant 0 : i32
    return %c0_i32, %c0_i32_0 : i32, i32
  }
  func.func @transform_4(%arg0: i32, %arg1: i32, %arg2: memref<2x8xi32, #tpu.memory_space<smem>>, %arg3: memref<2x8xi32, #tpu.memory_space<smem>>, %arg4: memref<8xi32, #tpu.memory_space<smem>>) -> (i32, i32) {
    %c0_i32 = arith.constant 0 : i32
    %c0_i32_0 = arith.constant 0 : i32
    %c0_i32_1 = arith.constant 0 : i32
    return %c0_i32, %c0_i32_0 : i32, i32
  }
  func.func @transform_5(%arg0: i32, %arg1: i32, %arg2: memref<2x8xi32, #tpu.memory_space<smem>>, %arg3: memref<2x8xi32, #tpu.memory_space<smem>>, %arg4: memref<8xi32, #tpu.memory_space<smem>>) -> (i32, i32) {
    %c0_i32 = arith.constant 0 : i32
    %c0_i32_0 = arith.constant 0 : i32
    %c0_i32_1 = arith.constant 0 : i32
    return %c0_i32, %c0_i32_0 : i32, i32
  }
  func.func @transform_6(%arg0: i32, %arg1: i32, %arg2: memref<2x8xi32, #tpu.memory_space<smem>>, %arg3: memref<2x8xi32, #tpu.memory_space<smem>>, %arg4: memref<8xi32, #tpu.memory_space<smem>>) -> (i32, i32) {
    %c0_i32 = arith.constant 0 : i32
    %c0_i32_0 = arith.constant 0 : i32
    %c0_i32_1 = arith.constant 0 : i32
    return %c0_i32, %c0_i32_0 : i32, i32
  }
  func.func @transform_7(%arg0: i32, %arg1: i32, %arg2: memref<2x8xi32, #tpu.memory_space<smem>>, %arg3: memref<2x8xi32, #tpu.memory_space<smem>>, %arg4: memref<8xi32, #tpu.memory_space<smem>>) -> (i32, i32) {
    %c0_i32 = arith.constant 0 : i32
    %c0_i32_0 = arith.constant 0 : i32
    %c0_i32_1 = arith.constant 0 : i32
    return %c0_i32, %c0_i32_0 : i32, i32
  }
  func.func @transform_8(%arg0: i32, %arg1: i32, %arg2: memref<2x8xi32, #tpu.memory_space<smem>>, %arg3: memref<2x8xi32, #tpu.memory_space<smem>>, %arg4: memref<8xi32, #tpu.memory_space<smem>>) -> (i32, i32) {
    %c0_i32 = arith.constant 0 : i32
    %c0_i32_0 = arith.constant 0 : i32
    %c0_i32_1 = arith.constant 0 : i32
    return %c0_i32, %c0_i32_0 : i32, i32
  }
  func.func @transform_9(%arg0: i32, %arg1: i32, %arg2: memref<2x8xi32, #tpu.memory_space<smem>>, %arg3: memref<2x8xi32, #tpu.memory_space<smem>>, %arg4: memref<8xi32, #tpu.memory_space<smem>>) -> (i32, i32) {
    %c0_i32 = arith.constant 0 : i32
    %c0_i32_0 = arith.constant 0 : i32
    %c0_i32_1 = arith.constant 0 : i32
    return %c0_i32, %c0_i32_0 : i32, i32
  }
  func.func @transform_10(%arg0: i32, %arg1: i32, %arg2: memref<2x8xi32, #tpu.memory_space<smem>>, %arg3: memref<2x8xi32, #tpu.memory_space<smem>>, %arg4: memref<8xi32, #tpu.memory_space<smem>>) -> (i32, i32) {
    %c0_i32 = arith.constant 0 : i32
    %c0_i32_0 = arith.constant 0 : i32
    %c0_i32_1 = arith.constant 0 : i32
    return %c0_i32, %c0_i32_0 : i32, i32
  }
  func.func @transform_11(%arg0: i32, %arg1: i32, %arg2: memref<2x8xi32, #tpu.memory_space<smem>>, %arg3: memref<2x8xi32, #tpu.memory_space<smem>>, %arg4: memref<8xi32, #tpu.memory_space<smem>>) -> (i32, i32) {
    %c0_i32 = arith.constant 0 : i32
    %c0_i32_0 = arith.constant 0 : i32
    %c0_i32_1 = arith.constant 0 : i32
    return %c0_i32, %c0_i32_0 : i32, i32
  }
  func.func @transform_12(%arg0: i32, %arg1: i32, %arg2: memref<2x8xi32, #tpu.memory_space<smem>>, %arg3: memref<2x8xi32, #tpu.memory_space<smem>>, %arg4: memref<8xi32, #tpu.memory_space<smem>>) -> (i32, i32) {
    %c0_i32 = arith.constant 0 : i32
    %c0_i32_0 = arith.constant 0 : i32
    %c0_i32_1 = arith.constant 0 : i32
    return %c0_i32, %c0_i32_0 : i32, i32
  }
  func.func @transform_13(%arg0: i32, %arg1: i32, %arg2: memref<2x8xi32, #tpu.memory_space<smem>>, %arg3: memref<2x8xi32, #tpu.memory_space<smem>>, %arg4: memref<8xi32, #tpu.memory_space<smem>>) -> (i32, i32) {
    %c0_i32 = arith.constant 0 : i32
    %c0_i32_0 = arith.constant 0 : i32
    %c0_i32_1 = arith.constant 0 : i32
    return %c0_i32, %c0_i32_0 : i32, i32
  }
  func.func @transform_14(%arg0: i32, %arg1: i32, %arg2: memref<2x8xi32, #tpu.memory_space<smem>>, %arg3: memref<2x8xi32, #tpu.memory_space<smem>>, %arg4: memref<8xi32, #tpu.memory_space<smem>>) -> (i32, i32) {
    %c0_i32 = arith.constant 0 : i32
    %c0_i32_0 = arith.constant 0 : i32
    %c0_i32_1 = arith.constant 0 : i32
    return %c0_i32, %c0_i32_0 : i32, i32
  }
  func.func @transform_15(%arg0: i32, %arg1: i32, %arg2: memref<2x8xi32, #tpu.memory_space<smem>>, %arg3: memref<2x8xi32, #tpu.memory_space<smem>>, %arg4: memref<8xi32, #tpu.memory_space<smem>>) -> (i32, i32) {
    %c0_i32 = arith.constant 0 : i32
    %c0_i32_0 = arith.constant 0 : i32
    %c0_i32_1 = arith.constant 0 : i32
    return %c0_i32, %c0_i32_0 : i32, i32
  }
  func.func @transform_16(%arg0: i32, %arg1: i32, %arg2: memref<2x8xi32, #tpu.memory_space<smem>>, %arg3: memref<2x8xi32, #tpu.memory_space<smem>>, %arg4: memref<8xi32, #tpu.memory_space<smem>>) -> (i32, i32) {
    %c0_i32 = arith.constant 0 : i32
    %c0_i32_0 = arith.constant 0 : i32
    %c0_i32_1 = arith.constant 0 : i32
    return %c0_i32, %c0_i32_0 : i32, i32
  }
  func.func @transform_17(%arg0: i32, %arg1: i32, %arg2: memref<2x8xi32, #tpu.memory_space<smem>>, %arg3: memref<2x8xi32, #tpu.memory_space<smem>>, %arg4: memref<8xi32, #tpu.memory_space<smem>>) -> (i32, i32) {
    %c0_i32 = arith.constant 0 : i32
    %c0_i32_0 = arith.constant 0 : i32
    %c0_i32_1 = arith.constant 0 : i32
    return %c0_i32, %c0_i32_0 : i32, i32
  }
  func.func @transform_18(%arg0: i32, %arg1: i32, %arg2: memref<2x8xi32, #tpu.memory_space<smem>>, %arg3: memref<2x8xi32, #tpu.memory_space<smem>>, %arg4: memref<8xi32, #tpu.memory_space<smem>>) -> (i32, i32) {
    %c0_i32 = arith.constant 0 : i32
    %c0_i32_0 = arith.constant 0 : i32
    %c0_i32_1 = arith.constant 0 : i32
    return %c0_i32, %c0_i32_0 : i32, i32
  }
  func.func @transform_19(%arg0: i32, %arg1: i32, %arg2: memref<2x8xi32, #tpu.memory_space<smem>>, %arg3: memref<2x8xi32, #tpu.memory_space<smem>>, %arg4: memref<8xi32, #tpu.memory_space<smem>>) -> (i32, i32) {
    %c0_i32 = arith.constant 0 : i32
    %c0_i32_0 = arith.constant 0 : i32
    %c0_i32_1 = arith.constant 0 : i32
    return %c0_i32, %c0_i32_0 : i32, i32
  }
  func.func @transform_20(%arg0: i32, %arg1: i32, %arg2: memref<2x8xi32, #tpu.memory_space<smem>>, %arg3: memref<2x8xi32, #tpu.memory_space<smem>>, %arg4: memref<8xi32, #tpu.memory_space<smem>>) -> (i32, i32) {
    %c0_i32 = arith.constant 0 : i32
    %c0_i32_0 = arith.constant 0 : i32
    return %arg0, %c0_i32 : i32, i32
  }
}

</mosaic_0001>

<bundles_post_ra>
// kernel: gkt_forward.1
= control target key start
LH: loop header
LB: loop body
LE: loop exit
PB: predicated region body
PF: predicated region fallthrough
CT: control target
= control target key end

     0   :  { %s2895_s0 = inlined_call_operand.vmem [shape: s32[2,8], index: 0, kind: input, shape index: {}]   ;;  %s2896_s3 = inlined_call_operand.vmem [shape: f32[192,32], index: 3, kind: input, shape index: {}]   ;;  %s2897_s4 = inlined_call_operand.vmem [shape: f32[16,32], index: 4, kind: input, shape index: {}]   ;;  %s2898_s5 = inlined_call_operand.vmem [shape: f32[16,16], index: 5, kind: input, shape index: {}]   ;;  %s2899_s6 = inlined_call_operand.vmem [shape: f32[16,16], index: 6, kind: input, shape index: {}]   ;;  %s2900_s7 = inlined_call_operand.vmem [shape: bf16[64,96], index: 7, kind: input, shape index: {}]   ;;  %s2901_s8 = inlined_call_operand.vmem [shape: f32[1,32], index: 8, kind: input, shape index: {}]   ;;  %s2902_s9 = inlined_call_operand.vmem [shape: bf16[32,32], index: 9, kind: input, shape index: {}]   ;;  %s2903_s10 = inlined_call_operand.vmem [shape: f32[1,32], index: 10, kind: input, shape index: {}]   ;;  %s2904_s11 = inlined_call_operand.vmem [shape: bf16[64,160], index: 11, kind: input, shape index: {}]   ;;  %s2905_s12 = inlined_call_operand.vmem [shape: f32[1,64], index: 12, kind: input, shape index: {}]   ;;  %s2906_s13 = inlined_call_operand.vmem [shape: bf16[64,64], index: 13, kind: input, shape index: {}]   ;;  %s2907_s14 = inlined_call_operand.vmem [shape: f32[1,64], index: 14, kind: input, shape index: {}]   ;;  %s2908_s15 = inlined_call_operand.vmem [shape: bf16[32,64], index: 15, kind: input, shape index: {}]   ;;  %s2909_s16 = inlined_call_operand.vmem [shape: f32[1,64], index: 16, kind: input, shape index: {}]   ;;  %s2910_s17 = inlined_call_operand.vmem [shape: f32[32,32], index: 17, kind: input, shape index: {}]   ;;  %s2911_s18 = inlined_call_operand.vmem [shape: bf16[32,96], index: 18, kind: input, shape index: {}]   ;;  %s2912_s19 = inlined_call_operand.vmem [shape: f32[1,96], index: 19, kind: input, shape index: {}]   ;;  %s2913_s20 = inlined_call_operand.vmem [shape: f32[1,96], index: 20, kind: input, shape index: {}]   ;;  %s2914_s21 = inlined_call_operand.vmem [shape: f32[1,32], index: 21, kind: input, shape index: {}]   ;;  %s2915_s23 = inlined_call_operand.hbm [shape: f32[2,7], index: 23, kind: output, shape index: {}]   ;;  %s2916_s1 = inlined_call_operand.vmem [shape: s32[2,8], index: 1, kind: input, shape index: {}]   ;;  %s2917_s22 = inlined_call_operand.<no memory space> [shape: f32[1,1], index: 22, kind: input, shape index: {}]   ;;  %s2918_s2 = inlined_call_operand.vmem [shape: s32[8], index: 2, kind: input, shape index: {}]  }
   0x1   :  { %2933 = sst [smem:[#allocation12_spill]] %s2895_s0  ;;  %v40_v0 = vstv %s2917_s22 }
   0x2   :  { %2934 = sst [smem:[#allocation13_spill]] %s2896_s3  ;;  %s32_s3 = sshll.u32 %s2916_s1, 4  ;;  %41 = vst [vmem:[#allocation7] sm:$0x1] %v40_v0  ;;  %s33_s3 = int_to_ptr.vmem [resolvable:$true] %s32_s3 }
   0x3   :  { %2935 = sst [smem:[#allocation14_spill]] %s2897_s4 }
   0x4   :  { %2936 = sst [smem:[#allocation15_spill]] %s2898_s5 }
   0x5   :  { %2937 = sst [smem:[#allocation16_spill]] %s2899_s6 }
   0x6   :  { %2938 = sst [smem:[#allocation17_spill]] %s2900_s7 }
   0x7   :  { %2939 = sst [smem:[#allocation18_spill]] %s2901_s8 }
   0x8   :  { %2940 = sst [smem:[#allocation19_spill]] %s2902_s9 }
   0x9   :  { %2941 = sst [smem:[#allocation20_spill]] %s2912_s19 }
   0xa   :  { %2942 = sst [smem:[#allocation21_spill]] %s2914_s21 }
   0xb   :  { %s2943_s24 = sld [smem:[#allocation12_spill]] }
  0x11   :  { %s28_s19 = sshll.u32 %s2943_s24, 4  ;;  %s29_s19 = int_to_ptr.vmem [resolvable:$true] %s28_s19 }
  0x12   :  { %s2173_s4 = scalar_lea.vmem %s29_s19, 32  ;;  %p2178_p1 = scmp.lt.s32.totalorder %s29_s19, %s29_s19 }
  0x13   :  { %p2174_p0 = scmp.ne.s32.totalorder %s29_s19, %s2173_s4  ;;  %p2179_p2 = scmp.lt.s32.totalorder %s2173_s4, %s2173_s4 }
  0x15   :  { %p2180_p3 = por %p2179_p2, %p2178_p1 }
  0x17   :  { %p2181_p4 = pnand %p2180_p3, %p2174_p0 }
  0x19   :  { %2184 = shalt.err (!%p2181_p4)  }
  0x1a   :  { %s2263_s8 = smov [#allocation4]   ;;  %s2185_s27 = scalar_lea.vmem %s33_s3, 32 }
  0x1b   :  { %31 = dma.vmem_to_smem %s29_s19, 32, %s2263_s8, [#allocation3] }
  0x1c   :  { %p2186_p5 = scmp.ne.s32.totalorder %s33_s3, %s2185_s27  ;;  %p2190_p6 = scmp.lt.s32.totalorder %s33_s3, %s33_s3 }
  0x1d   :  { %p2191_p7 = scmp.lt.s32.totalorder %s2185_s27, %s2185_s27 }
  0x1f   :  { %p2192_p8 = por %p2191_p7, %p2190_p6 }
  0x21   :  { %p2193_p9 = pnand %p2192_p8, %p2186_p5 }
  0x23   :  { %2196 = shalt.err (!%p2193_p9)  }
  0x24   :  { %s2264_s1 = smov [#allocation5]   ;;  %s36_s9 = sshll.u32 %s2918_s2, 4  ;;  %s37_s9 = int_to_ptr.vmem [resolvable:$true] %s36_s9 }
  0x25   :  { %35 = dma.vmem_to_smem %s33_s3, 32, %s2264_s1, [#allocation3] }
  0x26   :  { %s2197_s28 = scalar_lea.vmem %s37_s9, 16  ;;  %p2202_p11 = scmp.lt.s32.totalorder %s37_s9, %s37_s9 }
  0x27   :  { %p2198_p10 = scmp.ne.s32.totalorder %s37_s9, %s2197_s28  ;;  %p2203_p12 = scmp.lt.s32.totalorder %s2197_s28, %s2197_s28 }
  0x29   :  { %p2204_p13 = por %p2203_p12, %p2202_p11 }
  0x2b   :  { %p2205_p0 = pnand %p2204_p13, %p2198_p10 }
  0x2d   :  { %2208 = shalt.err (!%p2205_p0)  }
  0x2e   :  { %s2265_s19 = smov [#allocation6]  }
  0x2f   :  { %39 = dma.vmem_to_smem %s37_s9, 16, %s2265_s19, [#allocation3] }
  0x30   :  { %2245 = dma.done.wait [#allocation3], 80 }
  0x31   :  { %2246 = vsyncadd [#allocation3], 4294967216 }
  0x32   :  { %43 = sfence }
  0x33   :  { %44 = vsyncpa [#allocation9], 0  ;;  %s2406_s29 = smov 0   ;;  %s2408_s5 = smov 0  }
  0x34   :  { %s2410_s0 = smov 0  }
  0x35 LB: > { %s59_s6 = sadd.s32 1, %s2257_s5  ;;  %p1897_p2 = scmp.ge.s32.totalorder %s2261_s0, 1  ;;  %s2261_s0 = sphi %s2410_s0, %s50_s0   ;;  %s2257_s5 = sphi %s2408_s5, %s2959_s5   ;;  %s2253_s29 = sphi %s2406_s29, %s2958_s29  }
  0x36   : > { %p60_p1 = scmp.ge.s32.totalorder %s59_s6, 7  ;;  %p584_p3 = scmp.lt.s32.totalorder %s2261_s0, 8 }
  0x38   : > { %s2961_s6 = smov (%p60_p1, %s59_s6), 0  ;;  %p585_p4 = pnand %p1897_p2, %p584_p3 }
  0x39   : > { %p1898_p5 = scmp.ne.s32.totalorder (!%p585_p4), %s2253_s29, 0 }
  0x3a   : > { %588 = sbr.rel (%p585_p4) target bundleno = 2249 (0x8c9), region = 100 }
  0x3f   : > { %637 = sbr.rel (%p1898_p5) target bundleno = 72 (0x48), region = 104 }
  0x44   : > { %vm638_vm0 = vcmask 261120   ;;  %vm643_vm1 = vcmask 50176   ;;  %v2266_v1 = vmov 0.0  }
  0x45   : > { %639 = vst.msk [vmem:[#allocation2] sm:$0xff] %vm638_vm0, %v2266_v1  ;;  %640 = vst.msk [vmem:[#allocation2 + $0x8] sm:$0xff] %vm638_vm0, %v2266_v1 }
  0x46   : > { %641 = vst.msk [vmem:[#allocation2 + $0x10] sm:$0xff] %vm638_vm0, %v2266_v1  ;;  %642 = vst.msk [vmem:[#allocation2 + $0x18] sm:$0xff] %vm638_vm0, %v2266_v1 }
  0x47   : > { %644 = vst.msk [vmem:[#allocation8] sm:$0x3] %vm643_vm1, %v2266_v1 }
  0x48 PF: > { %s663_s30 = sshra.s32 %s2253_s29, 7  ;;  %s668_s24 = sand.u32 127, %s2253_s29  ;;  %v658_v2 = vlaneseq  ;;  %v2267_v3 = vmov 0.0   ;;  %vm2268_vm2 = vmmov 0   ;;  %vm785_vm3 = vcmask 1040384  }
  0x49   : > { %s1899_s25 = sshll.u32 %s663_s30, 7  ;;  %1990 = vmatprep.subr.bf16.mxu0 %v2267_v3  ;;  %2002 = vmatprep.subr.bf16.mxu1 %v2267_v3  ;;  %s2944_s8 = sld [smem:[#allocation17_spill]]  ;;  %vm795_vm8 = vcmask 261120   ;;  %vm830_vm9 = vcmask 523264   ;;  %v2099_v58 = vld [vmem:[%s2904_s11 + $0x34] ss:$8 sps:$4 sm:$0xff]  }
  0x4a   : > { %s669_s7 = sadd.s32 %s1899_s25, %s668_s24  ;;  %s1965_s3 = sadd.s32 128, %s1899_s25  ;;  %v2438_v5 = vshrl.u32 %v658_v2, 7  ;;  %1998 = vmatprep.mubr.msk.bf16.mxu0 %vm2268_vm2, %v2267_v3  ;;  %2006 = vmatprep.mubr.msk.bf16.mxu1 %vm2268_vm2, %v2267_v3  ;;  %v2270_v59 = vmov 0   ;;  %vm707_vm12 = vcmask 130048   ;;  %vm1780_vm13 = vcmask 253952  }
  0x4b   : > { %s675_s27 = sld [smem:[#allocation5 + %s669_s7]]  ;;  %s727_s1 = sadd.s32 %s1965_s3, %s668_s24  ;;  %2090 = vset.pattern.permute.xlu1 %v2270_v59  ;;  %2089 = vset.pattern.permute.xlu0 %v2270_v59 }
  0x4c   : > { %s2435_s21 = sld [smem:[#allocation4 + %s727_s1]]  ;;  %v2450_v8 = vsub.s32 0, %v2438_v5  ;;  %v660_v12 = vadd.s32 8, %v2438_v5  ;;  %s2925_s3 = smov 32   ;;  %v1105_v60 = vsub.s32 1, %v2438_v5 }
  0x4d   : > { %s733_s28 = sld [smem:[#allocation5 + %s727_s1]] }
  0x4e   : > { %s2444_s19 = sld [smem:[#allocation4 + %s669_s7]] }
  0x4f   : > { %v2091_v4 = vld [vmem:[%s2944_s8 + $0x18] sm:$0xff]   ;;  %v2092_v6 = vld [vmem:[%s2944_s8 + $0x10] sm:$0xff]   ;;  %v2093_v7 = vld [vmem:[%s2944_s8 + $0x8] sm:$0xff]   ;;  %s2945_s4 = sld [smem:[#allocation19_spill]] }
  0x50   : > { %1991 = vmatpush3.bf16.msra.mxu0 %v2091_v4  ;;  %v2094_v9 = vld [vmem:[%s2944_s8] sm:$0xff]   ;;  %s2946_s9 = sld [smem:[#allocation13_spill]] }
  0x51   : > { %1992 = vmatprep.subr.bf16.mxu0 %v2267_v3  ;;  %p676_p6 = scmp.lt.s32.totalorder %s675_s27, 191  ;;  %s2947_s1 = sld [smem:[#allocation14_spill]] }
  0x52   : > { %p729_p7 = scmp.ne.s32.totalorder %s2435_s21, 4294967295  ;;  %s2949_s22 = sld [smem:[#allocation15_spill]] }
  0x53   : > { %s2963_s27 = smov (!%p676_p6, %s675_s27), 191  ;;  %p734_p8 = scmp.lt.s32.totalorder %s733_s28, 191 }
  0x54   : > { %1993 = vmatpush3.bf16.msra.mxu0 %v2092_v6  ;;  %p671_p9 = scmp.ne.s32.totalorder %s2444_s19, 4294967295 }
  0x55   : > { %1994 = vmatprep.subr.bf16.mxu0 %v2267_v3  ;;  %v2095_v10 = vld [vmem:[%s2945_s4 + $0x8] sm:$0xff]   ;;  %s2965_s28 = smov (!%p734_p8, %s733_s28), 191  ;;  %v2096_v57 = vld [vmem:[%s2945_s4] sm:$0xff]  }
  0x56   : > { %s688_s30 = scalar_lea.vmem %s2946_s9, %s2963_s27  ;;  %2003 = vmatpush3.bf16.msra.mxu1 %v2095_v10  ;;  %s746_s7 = scalar_lea.vmem %s2946_s9, %s2965_s28 }
  0x57   : > { %v689_v11 = vld [vmem:[%s688_s30] sm:$0x1]  ;;  %2004 = vmatprep.subr.bf16.mxu1 %v2267_v3  ;;  %s2472_s25 = scalar_select %p671_p9, %s2444_s19, 0  ;;  %v653_v23 = vld [vmem:[%s2947_s1 + $0x8] sm:$0xff] }
  0x58   : > { %1995 = vmatpush3.bf16.msra.mxu0 %v2093_v7  ;;  %v693_v13 = vrot.slane %v689_v11, %v2450_v8  ;;  %v747_v14 = vld [vmem:[%s746_s7] sm:$0x1]  ;;  %s2484_s27 = scalar_select %p729_p7, %s2435_s21, 0 }
  0x59   : > { %1996 = vmatprep.subr.bf16.mxu0 %v2267_v3  ;;  %v2479_v15 = vstv %s2472_s25  ;;  %v788_v16 = vrot.slane %v747_v14, 7  ;;  %v652_v17 = vld [vmem:[%s2947_s1] sm:$0xff]  ;;  %v751_v20 = vrot.slane %v747_v14, %v2450_v8  ;;  %s2510_s24 = scalar_select %p671_p9, 1, 0  ;;  %v2105_v14 = vld [vmem:[%s2904_s11 + $0x14] ss:$8 sps:$4 sm:$0xff]  }
  0x5a   : > { %vm679_vm4 = vcmp.eq.s32.totalorder %v2438_v5, %v2479_v15  ;;  %vm680_vm5 = vcmp.eq.s32.totalorder %v660_v12, %v2479_v15  ;;  %v2500_v21 = vstv %s2484_s27  ;;  %s2517_s7 = scalar_select %p729_p7, 1, 0  ;;  %2005 = vmatpush3.bf16.msra.mxu1 %v2096_v57 }
  0x5b   : > { %v2493_v18 = vsel %vm679_vm4, 1.0, %v2267_v3  ;;  %v2496_v19 = vsel %vm680_vm5, 1.0, %v2267_v3  ;;  %v790_v22 = vsel %vm785_vm3, %v689_v11, %v788_v16  ;;  %vm737_vm6 = vcmp.eq.s32.totalorder %v2438_v5, %v2500_v21  ;;  %s673_s19 = scvt.s32.f32 %s2510_s24  ;;  %s1868_s28 = scalar_lea.vmem [#allocation2], %s2484_s27  ;;  %1037 = vmatprep.subr.bf16.mxu1 %v2099_v58  ;;  %v2102_v11 = vld [vmem:[%s2904_s11 + $0x24] ss:$8 sps:$4 sm:$0xff]  }
  0x5c   : > { %1997 = vmatpush3.bf16.msra.mxu0 %v2094_v9  ;;  %v694_v24 = vmul.f32 %v2493_v18, %v693_v13  ;;  %v696_v25 = vsub.f32 1.0, %v2493_v18  ;;  %792 = vrot.lane.b32.xlu0 %v790_v22, %s2925_s3  ;;  %v695_v26 = vmul.f32 %v2496_v19, %v693_v13  ;;  %v697_v27 = vsub.f32 1.0, %v2496_v19  ;;  %s731_s21 = scvt.s32.f32 %s2517_s7  ;;  %v1907_v50 = vld [vmem:[%s1868_s28 + $0x10] sm:$0x1]  ;;  %s722_s26 = scalar_lea.vmem [#allocation2], %s2472_s25 }
  0x5d   : > { %vm738_vm7 = vcmp.eq.s32.totalorder %v660_v12, %v2500_v21  ;;  %v2526_v29 = vsel %vm737_vm6, 1.0, %v2267_v3  ;;  %v2536_v35 = vstv %s673_s19  ;;  %v783_v51 = vrot.slane %v1907_v50, 7  ;;  %v723_v52 = vld [vmem:[%s722_s26] sm:$0x1]  ;;  %s2948_s28 = sld [smem:[#allocation18_spill]]  ;;  %s2927_s26 = smov 96  }
  0x5e   : > { %v698_v28 = vmul.f32 %v696_v25, %v652_v17  ;;  %v2529_v30 = vsel %vm738_vm7, 1.0, %v2267_v3  ;;  %v699_v31 = vmul.f32 %v697_v27, %v653_v23  ;;  %v752_v32 = vmul.f32 %v2526_v29, %v751_v20  ;;  %v2097_v9 = vld [vmem:[%s2904_s11 + $0x30] ss:$8 sps:$4 sm:$0xff]   ;;  %v2100_v13 = vld [vmem:[%s2904_s11 + $0x20] ss:$8 sps:$4 sm:$0xff]   ;;  %s2950_s25 = sld [smem:[#allocation16_spill]] }
  0x5f   : > { %v753_v33 = vmul.f32 %v2529_v30, %v751_v20  ;;  %v754_v36 = vsub.f32 1.0, %v2526_v29  ;;  %v755_v37 = vsub.f32 1.0, %v2529_v30  ;;  %v2546_v43 = vstv %s731_s21  ;;  %s2929_s21 = smov 64   ;;  %s2952_s1 = smov 64  }
  0x60   : > { %v700_v34 = vadd.f32 %v698_v28, %v694_v24  ;;  %v701_v38 = vadd.f32 %v699_v31, %v695_v26  ;;  %v786_v53 = vsel %vm785_vm3, %v723_v52, %v783_v51  ;;  %v2590_v24 = vld [vmem:[#allocation2 + $0x8] sm:$0xff]  ;;  %s2954_s30 = smov 32   ;;  %s1766_s27 = sadd.s32 1, %s2253_s29  ;;  %vm1838_vm4 = vcmask 50176  }
  0x61   : > { %v756_v40 = vmul.f32 %v754_v36, %v652_v17  ;;  %v757_v41 = vmul.f32 %v755_v37, %v653_v23  ;;  %v2103_v17 = vld [vmem:[%s2904_s11 + $0x10] ss:$8 sps:$4 sm:$0xff]   ;;  %v2588_v23 = vld [vmem:[#allocation2] sm:$0xff] }
  0x62   : > { %v703_v39 = vmul.f32 %v2536_v35, %v700_v34  ;;  %v704_v42 = vmul.f32 %v2536_v35, %v701_v38  ;;  %v2108_v26 = vld [vmem:[%s2904_s11 + $0x4] ss:$8 sps:$4 sm:$0xff]   ;;  %v2603_v34 = vand.u32 127, %v658_v2 }
  0x63   : > { %v758_v44 = vadd.f32 %v756_v40, %v752_v32  ;;  %v759_v45 = vadd.f32 %v757_v41, %v753_v33  ;;  %v1913_v61 = vld [vmem:[%s2948_s28] ss:$0 sm:$0xff]  ;;  %v2605_v41 = vld [vmem:[#allocation2 + $0x10] sm:$0xff] }
  0x64   : > { %v2079_v46 = vpack.i.bf16 %v704_v42, %v703_v39  ;;  %v2106_v32 = vld [vmem:[%s2904_s11] ss:$8 sps:$4 sm:$0xff]   ;;  %v2607_v42 = vld [vmem:[#allocation2 + $0x18] sm:$0xff]  ;;  %vm685_vm10 = vcmp.eq.s32.totalorder %v2603_v34, %v2479_v15  ;;  %vm743_vm11 = vcmp.eq.s32.totalorder %v2603_v34, %v2500_v21 }
  0x65   : > { %v761_v47 = vmul.f32 %v2546_v43, %v758_v44  ;;  %v762_v48 = vmul.f32 %v2546_v43, %v759_v45  ;;  %v655_v45 = vld [vmem:[%s2949_s22 + $0x8] sm:$0xff] }
  0x66   : > { %2080 = vrot.lane.b32.xlu0 %v2079_v46, %s2925_s3  ;;  %v1902_v46 = vsel %vm685_vm10, 1.0, %v2267_v3 }
  0x67   : > { %v2084_v49 = vpack.i.bf16 %v762_v48, %v761_v47  ;;  %v715_v15 = vmul.f32 %v1902_v46, %v655_v45  ;;  %v654_v48 = vld [vmem:[%s2949_s22] sm:$0xff] }
  0x68   : > { %v714_v52 = vmul.f32 %v1902_v46, %v654_v48 }
  0x69   : > { %2085 = vrot.lane.b32.xlu1 %v2084_v49, %s2925_s3  ;;  %v1906_v49 = vsel %vm743_vm11, 1.0, %v2267_v3  ;;  %v719_v50 = vsel %vm707_vm12, %v715_v15, 0.0  ;;  %v657_v3 = vld [vmem:[%s2950_s25 + $0x8] sm:$0xff]  ;;  %s2951_s3 = smov 96  }
  0x6a   : > { %v771_v51 = vmul.f32 %v1906_v49, %v654_v48 }
  0x6c   : > { %v773_v21 = vsel %vm707_vm12, %v771_v51, 0.0 }
  0xce   : > { %v793_v54 = vpop.permute.xlu0 %792 }
  0xcf   : > { %v796_v55 = vsel %vm795_vm8, %v786_v53, %v793_v54  ;;  %v656_v53 = vld [vmem:[%s2950_s25] sm:$0xff] }
  0xd0   : > { %v797_v56 = vpack.c.bf16 %v796_v55, %v796_v55  ;;  %v705_v54 = vmul.f32 %v1902_v46, %v656_v53  ;;  %v716_v55 = vsel %vm707_vm12, %v714_v52, 0.0  ;;  %v763_v58 = vmul.f32 %v1906_v49, %v656_v53 }
  0xd2   : > { %1999 = vmatmul.mubr.msk.bf16.vlgmr.msra.gmra.mxu0 %vm830_vm9, %v797_v56  ;;  %v772_v56 = vmul.f32 %v1906_v49, %v655_v45  ;;  %v708_v57 = vsel %vm707_vm12, %v705_v54, 0.0 }
  0xd8   : > { %v2081_v16 = vpop.permute.xlu0 %2080 }
  0xd9   : > { %v2083_v20 = vunpack.i.h.bf16 %v2081_v16  ;;  %v2082_v22 = vunpack.i.l.bf16 %v2081_v16 }
  0xdb   : > { %v969_v28 = vsel %vm795_vm8, %v2588_v23, %v2082_v22  ;;  %v970_v31 = vsel %vm795_vm8, %v2590_v24, %v2083_v20  ;;  %v2086_v33 = vpop.permute.xlu1 %2085 }
  0xdc   : > { %v973_v38 = vpack.c.bf16 %v970_v31, %v969_v28  ;;  %v2088_v39 = vunpack.i.h.bf16 %v2086_v33  ;;  %v2087_v40 = vunpack.i.l.bf16 %v2086_v33 }
  0xde   : > { %v971_v44 = vsel %vm795_vm8, %v2605_v41, %v2087_v40  ;;  %v972_v2 = vsel %vm795_vm8, %v2607_v42, %v2088_v39 }
  0xdf   : > { %v974_v47 = vpack.c.bf16 %v972_v2, %v971_v44 }
 0x192   : > { %v868_v62 = vpop.f32.mrf.mxu0 }
 0x193   : > { %v881_v63 = vadd.f32 %v1913_v61, %v868_v62  ;;  %v1102_v0 = vrot.slane %v868_v62, %v2450_v8  ;;  %v1106_v1 = vrot.slane %v868_v62, %v1105_v60  ;;  %v706_v61 = vmul.f32 %v1902_v46, %v657_v3 }
 0x194   : > { %v2000_v4 = vpop.f32.mrf.mxu0  ;;  %v765_v62 = vsel %vm707_vm12, %v763_v58, 0.0 }
 0x195   : > { %v882_v6 = vmax.f32 %v881_v63, 0.0  ;;  %1109 = vrot.lane.b32.xlu1 %v1102_v0, %s2927_s26  ;;  %1111 = vrot.lane.b32.xlu0 %v1106_v1, %s2927_s26  ;;  %v711_v63 = vsel %vm707_vm12, %v706_v61, 0.0  ;;  %v764_v0 = vmul.f32 %v1906_v49, %v657_v3  ;;  %v2109_v4 = vld [vmem:[%s2906_s13 + $0x18] sm:$0xff]   ;;  %s645_s26 = sld [smem:[#allocation6 + %s2253_s29]] }
 0x196   : > { %v871_v7 = vpop.f32.mrf.mxu0  ;;  %2010 = vmatprep.subr.bf16.mxu0 %v2109_v4 }
 0x197   : > { %v883_v10 = vpack.c.bf16 %v882_v6, %v882_v6  ;;  %v768_v1 = vsel %vm707_vm12, %v764_v0, 0.0  ;;  %2011 = vmatpush3.bf16.msra.mxu0 %v2109_v4  ;;  %v2110_v6 = vld [vmem:[%s2906_s13 + $0x10] sm:$0xff]   ;;  %v2111_v7 = vld [vmem:[%s2906_s13 + $0x8] sm:$0xff]  }
 0x198   : > { %v2001_v12 = vpop.f32.mrf.mxu0  ;;  %2012 = vmatprep.subr.bf16.mxu0 %v2110_v6  ;;  %v2113_v4 = vld [vmem:[%s2908_s15 + $0x8] sm:$0xff]  }
 0x199   : > { %2007 = vmatmul.mubr.msk.bf16.vlgmr.msra.gmra.mxu1 %vm795_vm8, %v883_v10 }
 0x19a   : > { %1038 = vmatpush1.bf16.msra.mxu1 %v2097_v9  ;;  %1061 = vmatprep.mubr.bf16.mxu1 %v2270_v59  ;;  %v2112_v9 = vld [vmem:[%s2906_s13] sm:$0xff]  }
 0x19b   : > { %1039 = vmatprep.subr.bf16.mxu1 %v2102_v11  ;;  %2013 = vmatpush3.bf16.msra.mxu0 %v2110_v6  ;;  %p646_p10 = scmp.eq.s32.totalorder %s645_s26, 1  ;;  %s2953_s26 = sld [smem:[#allocation20_spill]] }
 0x19c   : > { %2014 = vmatprep.subr.bf16.mxu0 %v2111_v7 }
 0x19d   : > { %s647_s19 = scalar_select %p646_p10, 1.0, 0.999995 }
 0x19e   : > { %1040 = vmatpush1.bf16.msra.mxu1 %v2100_v13 }
 0x19f   : > { %1041 = vmatprep.subr.bf16.mxu1 %v2105_v14  ;;  %2015 = vmatpush3.bf16.msra.mxu0 %v2111_v7 }
 0x1a0   : > { %2016 = vmatprep.subr.bf16.mxu0 %v2112_v9 }
 0x1a2   : > { %1042 = vmatpush1.bf16.msra.mxu1 %v2103_v17 }
 0x1a3   : > { %1043 = vmatprep.subr.bf16.mxu1 %v2108_v26  ;;  %2017 = vmatpush3.bf16.msra.mxu0 %v2112_v9 }
 0x1a4   : > { %2022 = vmatprep.subr.bf16.mxu0 %v2113_v4 }
 0x1a6   : > { %1044 = vmatpush1.bf16.msra.mxu1 %v2106_v32 }
 0x1a9   : > { %1926 = vmatmul.mubr.msk.bf16.vlgmr.msra.gmra.mxu1 %vm830_vm9, %v973_v38  ;;  %v1929_v38 = vld [vmem:[%s2905_s12] ss:$0 sm:$0xff] }
 0x1aa   : > { %1071 = vmatprep.mubr.bf16.mxu1 %v2270_v59  ;;  %v776_v59 = vsel %vm707_vm12, %v772_v56, 0.0  ;;  %v1930_v56 = vld [vmem:[%s2907_s14] ss:$0 sm:$0xff] }
 0x1b1   : > { %1927 = vmatmul.mubr.msk.bf16.gmra.mxu1 %vm830_vm9, %v974_v47 }
 0x1b4   : > { %720 = vadd.xlane.f32.xlu0 %v719_v50 }
 0x1b8   : > { %774 = vadd.xlane.f32.xlu0 %v773_v21 }
 0x1b9   : > { %717 = vadd.xlane.f32.xlu1 %v716_v55 }
 0x1bc   : > { %709 = vadd.xlane.f32.xlu0 %v708_v57 }
 0x1bd   : > { %777 = vadd.xlane.f32.xlu1 %v776_v59 }
 0x1c0   : > { %766 = vadd.xlane.f32.xlu0 %v765_v62 }
 0x1c1   : > { %712 = vadd.xlane.f32.xlu1 %v711_v63 }
 0x1c5   : > { %769 = vadd.xlane.f32.xlu1 %v768_v1 }
 0x207   : > { %v1112_v10 = vpop.permute.xlu0 %1111  ;;  %v1110_v12 = vpop.permute.xlu1 %1109 }
 0x23d   : > { %v721_v11 = vpop.xlane.xlu0 %720 }
 0x23e   : > { %1269 = vperm.xlu1 %2090, %v721_v11  }
 0x241   : > { %v775_v13 = vpop.xlane.xlu0 %774 }
 0x242   : > { %v718_v14 = vpop.xlane.xlu1 %717  ;;  %1274 = vperm.xlu1 %2090, %v775_v13  }
 0x243   : > { %1264 = vperm.xlu0 %2089, %v718_v14  }
 0x245   : > { %v710_v17 = vpop.xlane.xlu0 %709 }
 0x246   : > { %v778_v16 = vpop.xlane.xlu1 %777 }
 0x247   : > { %1279 = vperm.xlu1 %2090, %v778_v16   ;;  %1325 = vperm.xlu0 %2089, %v697_v27   ;;  %v2114_v16 = vld [vmem:[%s2908_s15] sm:$0xff]  }
 0x249   : > { %v767_v22 = vpop.xlane.xlu0 %766 }
 0x24a   : > { %v713_v20 = vpop.xlane.xlu1 %712 }
 0x24b   : > { %1240 = vperm.xlu1 %2090, %v710_v17   ;;  %1335 = vperm.xlu0 %2089, %v755_v37  }
 0x24e   : > { %v770_v26 = vpop.xlane.xlu1 %769 }
 0x24f   : > { %1245 = vperm.xlu1 %2090, %v713_v20  }
 0x253   : > { %1250 = vperm.xlu1 %2090, %v767_v22  }
 0x257   : > { %1255 = vperm.xlu1 %2090, %v770_v26  }
 0x259   : > { %v2657_v28 = vpop.f32.mrf.mxu1 }
 0x25b   : > { %v2008_v31 = vpop.f32.mrf.mxu1  ;;  %1320 = vperm.xlu1 %2090, %v696_v25  }
 0x25d   : > { %v947_v32 = vpop.f32.mrf.mxu1 }
 0x25f   : > { %v2009_v33 = vpop.f32.mrf.mxu1  ;;  %1330 = vperm.xlu1 %2090, %v754_v36  }
 0x269   : > { %v2663_v27 = vpop.f32.mrf.mxu1 }
 0x26a   : > { %v1115_v37 = vadd.f32 %v1110_v12, %v2663_v27 }
 0x26b   : > { %v2669_v39 = vpop.f32.mrf.mxu1 }
 0x26c   : > { %v1126_v44 = vadd.f32 %v1929_v38, %v1115_v37 }
 0x26d   : > { %v2671_v40 = vpop.f32.mrf.mxu1 }
 0x26e   : > { %v1116_v25 = vadd.f32 %v1110_v12, %v2671_v40  ;;  %v1130_v36 = vmax.f32 %v1126_v44, 0.0 }
 0x26f   : > { %v2674_v2 = vpop.f32.mrf.mxu1 }
 0x270   : > { %v1127_v45 = vadd.f32 %v1929_v38, %v1116_v25  ;;  %v1914_v25 = vld [vmem:[%s2903_s10] ss:$0 sm:$0xff] }
 0x271   : > { %v2676_v46 = vpop.f32.mrf.mxu1 }
 0x272   : > { %v1131_v47 = vmax.f32 %v1127_v45, 0.0  ;;  %v1117_v15 = vadd.f32 %v1112_v10, %v2676_v46 }
 0x273   : > { %v2679_v48 = vpop.f32.mrf.mxu1 }
 0x274   : > { %v1134_v49 = vpack.c.bf16 %v1131_v47, %v1130_v36  ;;  %v1128_v51 = vadd.f32 %v1929_v38, %v1117_v15  ;;  %v945_v36 = vadd.f32 %v1914_v25, %v2657_v28 }
 0x275   : > { %v2681_v50 = vpop.f32.mrf.mxu1 }
 0x276   : > { %v1118_v52 = vadd.f32 %v1112_v10, %v2681_v50  ;;  %2018 = vmatprep.mubr.msk.bf16.mxu0 %vm830_vm9, %v1134_v49  ;;  %v1132_v21 = vmax.f32 %v1128_v51, 0.0  ;;  %v950_v15 = vmax.f32 %v945_v36, 0.0  ;;  %v951_v49 = vstv %s647_s19  ;;  %v1928_v36 = vld [vmem:[%s2913_s20] ss:$0 sm:$0xff]  ;;  %s1767_s19 = sshra.s32 %s1766_s27, 7 }
 0x277   : > { %s1955_s2 = sshll.u32 %s1767_s19, 7 }
 0x278   : > { %v1129_v53 = vadd.f32 %v1929_v38, %v1118_v52  ;;  %v952_v52 = vmul.f32 %v951_v49, %v950_v15 }
 0x27a   : > { %v1133_v54 = vmax.f32 %v1129_v53, 0.0 }
 0x27c   : > { %v1135_v55 = vpack.c.bf16 %v1133_v54, %v1132_v21  ;;  %v1309_v21 = vrot.slane %v952_v52, %v2450_v8 }
 0x27e   : > { %2019 = vmatmul.mubr.msk.bf16.vlgmr.msra.gmra.mxu0 %vm830_vm9, %v1135_v55  ;;  %v1311_v8 = vmul.f32 %v2496_v19, %v1309_v21 }
 0x27f   : > { %2023 = vmatpush3.bf16.msra.mxu0 %v2113_v4 }
 0x280   : > { %2024 = vmatprep.subr.bf16.mxu0 %v2114_v16 }
 0x283   : > { %2025 = vmatpush3.bf16.msra.mxu0 %v2114_v16 }
 0x2b9   : > { %v1270_v61 = vpop.permute.xlu1 %1269 }
 0x2bd   : > { %v1275_v17 = vpop.permute.xlu1 %1274 }
 0x2be   : > { %v1265_v10 = vpop.permute.xlu0 %1264 }
 0x2c2   : > { %v1280_v32 = vpop.permute.xlu1 %1279  ;;  %v1326_v51 = vpop.permute.xlu0 %1325 }
 0x2c6   : > { %v1241_v37 = vpop.permute.xlu1 %1240  ;;  %v1336_v55 = vpop.permute.xlu0 %1335 }
 0x2ca   : > { %v1246_v38 = vpop.permute.xlu1 %1245 }
 0x2ce   : > { %v1251_v44 = vpop.permute.xlu1 %1250 }
 0x2d2   : > { %v1256_v45 = vpop.permute.xlu1 %1255 }
 0x2d6   : > { %v1321_v47 = vpop.permute.xlu1 %1320 }
 0x2da   : > { %v1331_v53 = vpop.permute.xlu1 %1330 }
 0x33e   : > { %v2020_v3 = vpop.f32.mrf.mxu0 }
 0x33f   : > { %v1224_v57 = vadd.f32 %v2020_v3, %v1930_v56 }
 0x340   : > { %v1215_v58 = vpop.f32.mrf.mxu0 }
 0x341   : > { %v1216_v59 = vadd.f32 %v1930_v56, %v1215_v58  ;;  %v1232_v63 = vmax.f32 %v1224_v57, 0.0  ;;  %v1315_v57 = vrot.slane %v952_v52, %v1105_v60  ;;  %v1310_v58 = vmul.f32 %v2493_v18, %v1309_v21 }
 0x342   : > { %v2021_v62 = vpop.f32.mrf.mxu0 }
 0x343   : > { %v1230_v0 = vmax.f32 %v1216_v59, 0.0  ;;  %v1227_v1 = vadd.f32 %v2021_v62, %v1930_v56  ;;  %v1236_v11 = vmul.f32 0.999995, %v1232_v63 }
 0x344   : > { %v1218_v6 = vpop.f32.mrf.mxu0 }
 0x345   : > { %v1234_v7 = vmul.f32 0.999995, %v1230_v0  ;;  %v1219_v9 = vadd.f32 %v1930_v56, %v1218_v6  ;;  %v1233_v13 = vmax.f32 %v1227_v1, 0.0  ;;  %v1284_v22 = vmul.f32 %v1275_v17, %v1236_v11  ;;  %v1937_v17 = vld [vmem:[%s2909_s16] ss:$0 sm:$0xff] }
 0x347   : > { %v1282_v12 = vmul.f32 %v1265_v10, %v1234_v7  ;;  %v1231_v14 = vmax.f32 %v1219_v9, 0.0  ;;  %v1237_v26 = vmul.f32 0.999995, %v1233_v13  ;;  %v1258_v54 = vmul.f32 %v1241_v37, %v1234_v7 }
 0x348   : > { %v1316_v7 = vmul.f32 %v2526_v29, %v1315_v57  ;;  %v2115_v29 = vld [vmem:[%s2911_s18 + $0x8] sm:$0xff]  }
 0x349   : > { %v1235_v20 = vmul.f32 0.999995, %v1231_v14  ;;  %1290 = vrot.lane.b32.xlu1 %v1282_v12, %s2951_s3  ;;  %v1285_v33 = vmul.f32 %v1280_v32, %v1237_v26  ;;  %v1261_v10 = vmul.f32 %v1256_v45, %v1237_v26  ;;  %2030 = vmatprep.subr.bf16.mxu1 %v2115_v29 }
 0x34a   : > { %2031 = vmatpush3.bf16.msra.mxu1 %v2115_v29 }
 0x34b   : > { %v1283_v31 = vmul.f32 %v1270_v61, %v1235_v20  ;;  %v1259_v28 = vmul.f32 %v1246_v38, %v1235_v20  ;;  %v1260_v61 = vmul.f32 %v1251_v44, %v1236_v11  ;;  %v1317_v11 = vmul.f32 %v2529_v30, %v1315_v57  ;;  %v2116_v38 = vld [vmem:[%s2911_s18] sm:$0xff]  }
 0x34c   : > { %2032 = vmatprep.subr.bf16.mxu1 %v2116_v38 }
 0x34d   : > { %1292 = vrot.lane.b32.xlu0 %v1283_v31, %s2951_s3  ;;  %1294 = vrot.lane.b32.xlu1 %v1284_v22, %s2951_s3 }
 0x34e   : > { %2033 = vmatpush3.bf16.msra.mxu1 %v2116_v38 }
 0x351   : > { %1296 = vrot.lane.b32.xlu0 %v1285_v33, %s2951_s3 }
 0x3bb   : > { %v1291_v56 = vpop.permute.xlu1 %1290 }
 0x3bc   : > { %v1302_v3 = vadd.f32 %v1291_v56, %v1258_v54 }
 0x3be   : > { %v1338_v59 = vmul.f32 %v1321_v47, %v1302_v3 }
 0x3bf   : > { %v1293_v62 = vpop.permute.xlu0 %1292  ;;  %v1295_v63 = vpop.permute.xlu1 %1294 }
 0x3c0   : > { %v2708_v0 = vadd.f32 %v1338_v59, %v1310_v58  ;;  %v1303_v1 = vadd.f32 %v1293_v62, %v1259_v28  ;;  %v1304_v4 = vadd.f32 %v1295_v63, %v1260_v61  ;;  %v1454_v61 = vld [vmem:[%s2910_s17] sm:$0xff]  ;;  %v1455_v62 = vld [vmem:[%s2910_s17 + $0x8] sm:$0xff] }
 0x3c2   : > { %v1339_v6 = vmul.f32 %v1326_v51, %v1303_v1  ;;  %v1340_v9 = vmul.f32 %v1331_v53, %v1304_v4 }
 0x3c3   : > { %v1297_v5 = vpop.permute.xlu0 %1296 }
 0x3c4   : > { %v2712_v60 = vadd.f32 %v1339_v6, %v1311_v8  ;;  %v2714_v18 = vadd.f32 %v1340_v9, %v1316_v7  ;;  %v1305_v12 = vadd.f32 %v1297_v5, %v1261_v10  ;;  %v1456_v6 = vld [vmem:[%s2910_s17 + $0x10] sm:$0xff]  ;;  %v1457_v7 = vld [vmem:[%s2910_s17 + $0x18] sm:$0xff] }
 0x3c6   : > { %v1341_v13 = vmul.f32 %v1336_v55, %v1305_v12  ;;  %v1346_v14 = vpack.c.bf16 %v2712_v60, %v2708_v0 }
 0x3c8   : > { %v2719_v16 = vadd.f32 %v1341_v13, %v1317_v11  ;;  %2026 = vmatprep.mubr.msk.bf16.mxu0 %vm795_vm8, %v1346_v14 }
 0x3ca   : > { %v1347_v19 = vpack.c.bf16 %v2719_v16, %v2714_v18 }
 0x3cc   : > { %2027 = vmatmul.mubr.msk.bf16.vlgmr.msra.gmra.mxu0 %vm795_vm8, %v1347_v19 }
 0x48c   : > { %v2028_v30 = vpop.f32.mrf.mxu0 }
 0x48d   : > { %v1420_v31 = vadd.f32 %v2028_v30, %v1937_v17 }
 0x48e   : > { %v1411_v20 = vpop.f32.mrf.mxu0 }
 0x48f   : > { %v1412_v22 = vadd.f32 %v1937_v17, %v1411_v20  ;;  %v1944_v51 = vmul.f32 -1.442695, %v1420_v31 }
 0x490   : > { %v2029_v26 = vpop.f32.mrf.mxu0 }
 0x491   : > { %2117 = vtanh.f32 %v1412_v22  ;;  %v1423_v37 = vadd.f32 %v2029_v26, %v1937_v17  ;;  %v1942_v15 = vmul.f32 -1.442695, %v1412_v22 }
 0x492   : > { %v1414_v32 = vpop.f32.mrf.mxu0  ;;  %2119 = vtanh.f32 %v1420_v31 }
 0x493   : > { %v1415_v33 = vadd.f32 %v1937_v17, %v1414_v32  ;;  %v1945_v52 = vmul.f32 -1.442695, %v1423_v37 }
 0x495   : > { %2121 = vtanh.f32 %v1415_v33  ;;  %v1943_v49 = vmul.f32 -1.442695, %v1415_v33 }
 0x496   : > { %2123 = vtanh.f32 %v1423_v37 }
 0x497   : > { %2125 = vpow2.f32 %v1942_v15 }
 0x498   : > { %2127 = vpow2.f32 %v1943_v49  ;;  %v1946_v49 = vld [vmem:[%s2953_s26] ss:$0 sm:$0xff] }
 0x499   : > { %2129 = vpow2.f32 %v1944_v51 }
 0x49a   : > { %2131 = vpow2.f32 %v1945_v52 }
 0x49e   : > { %v2118_v44 = vpop.eup %2117 }
 0x49f   : > { %1474 = vrot.lane.b32.xlu1 %v2118_v44, %s2951_s3  ;;  %v2120_v25 = vpop.eup %2119 }
 0x4a2   : > { %v2122_v45 = vpop.eup %2121 }
 0x4a3   : > { %1476 = vrot.lane.b32.xlu0 %v2122_v45, %s2951_s3  ;;  %1478 = vrot.lane.b32.xlu1 %v2120_v25, %s2951_s3  ;;  %v2124_v47 = vpop.eup %2123 }
 0x4a4   : > { %v2126_v53 = vpop.eup %2125 }
 0x4a5   : > { %v2128_v21 = vpop.eup %2127  ;;  %v1438_v55 = vadd.f32 1.0, %v2126_v53 }
 0x4a6   : > { %v2130_v54 = vpop.eup %2129  ;;  %v1439_v3 = vadd.f32 1.0, %v2128_v21 }
 0x4a7   : > { %1480 = vrot.lane.b32.xlu0 %v2124_v47, %s2951_s3  ;;  %1088 = vrot.lane.b32.xlu1 %v1928_v36, %s2929_s21  ;;  %v2132_v56 = vpop.eup %2131  ;;  %v1440_v57 = vadd.f32 1.0, %v2130_v54  ;;  %2133 = vrcp.f32 %v1438_v55  ;;  %s1967_s21 = sadd.s32 128, %s1955_s2 }
 0x4a8   : > { %v1441_v58 = vadd.f32 1.0, %v2132_v56  ;;  %2135 = vrcp.f32 %v1439_v3 }
 0x4a9   : > { %2137 = vrcp.f32 %v1440_v57 }
 0x4aa   : > { %2139 = vrcp.f32 %v1441_v58 }
 0x4b4   : > { %v2134_v59 = vpop.eup %2133 }
 0x4b5   : > { %v2136_v28 = vpop.eup %2135  ;;  %v1458_v4 = vmul.f32 %v2134_v59, %v1454_v61 }
 0x4b6   : > { %v2138_v63 = vpop.eup %2137  ;;  %v1459_v8 = vmul.f32 %v2136_v28, %v1455_v62 }
 0x4b7   : > { %v2140_v1 = vpop.eup %2139  ;;  %v1460_v10 = vmul.f32 %v2138_v63, %v1456_v6  ;;  %v1462_v12 = vmul.f32 %v1458_v4, %v2708_v0 }
 0x4b8   : > { %v1461_v5 = vmul.f32 %v2140_v1, %v1457_v7  ;;  %v1463_v11 = vmul.f32 %v1459_v8, %v2712_v60 }
 0x4b9   : > { %v1464_v19 = vmul.f32 %v1460_v10, %v2714_v18  ;;  %v1466_v17 = vsub.f32 %v2708_v0, %v1462_v12 }
 0x4ba   : > { %v1465_v30 = vmul.f32 %v1461_v5, %v2719_v16  ;;  %v1467_v20 = vsub.f32 %v2712_v60, %v1463_v11 }
 0x4bb   : > { %v1468_v33 = vsub.f32 %v2714_v18, %v1464_v19 }
 0x4bc   : > { %v1469_v37 = vsub.f32 %v2719_v16, %v1465_v30 }
 0x511   : > { %v1475_v9 = vpop.permute.xlu1 %1474 }
 0x512   : > { %v1486_v13 = vmul.f32 %v1475_v9, %v1454_v61 }
 0x514   : > { %v1490_v26 = vadd.f32 %v1486_v13, %v1466_v17 }
 0x515   : > { %v1477_v14 = vpop.permute.xlu0 %1476  ;;  %v1479_v29 = vpop.permute.xlu1 %1478 }
 0x516   : > { %v1487_v22 = vmul.f32 %v1477_v14, %v1455_v62  ;;  %v1488_v32 = vmul.f32 %v1479_v29, %v1456_v6 }
 0x518   : > { %v1491_v31 = vadd.f32 %v1487_v22, %v1467_v20  ;;  %v1492_v60 = vadd.f32 %v1488_v32, %v1468_v33  ;;  %v1708_v32 = vsub.f32 1.0, %v2536_v35 }
 0x519   : > { %v1481_v38 = vpop.permute.xlu0 %1480  ;;  %v2762_v44 = vpop.permute.xlu1 %1088 }
 0x51a   : > { %v1494_v25 = vpack.c.bf16 %v1491_v31, %v1490_v26  ;;  %v1489_v45 = vmul.f32 %v1481_v38, %v1457_v7  ;;  %v1093_v36 = vadd.f32 %v2762_v44, %v2671_v40  ;;  %v1091_v0 = vadd.f32 %v2762_v44, %v2663_v27  ;;  %v1079_v40 = vpop.f32.mrf.mxu1 }
 0x51b   : > { %v1097_v16 = vadd.f32 %v2762_v44, %v2681_v50  ;;  %v1095_v15 = vadd.f32 %v2762_v44, %v2676_v46  ;;  %v1092_v13 = vadd.f32 %v2762_v44, %v2669_v39  ;;  %v1094_v30 = vadd.f32 %v2762_v44, %v2674_v2 }
 0x51c   : > { %v1493_v47 = vadd.f32 %v1489_v45, %v1469_v37  ;;  %1580 = vrot.lane.b32.xlu1 %v1093_v36, %s2952_s1  ;;  %1578 = vrot.lane.b32.xlu0 %v1091_v0, %s2952_s1  ;;  %v1096_v17 = vadd.f32 %v2762_v44, %v2679_v48  ;;  %v1098_v31 = vadd.f32 %v2762_v44, %v1079_v40  ;;  %v1709_v48 = vsub.f32 1.0, %v2546_v43 }
 0x51d   : > { %2034 = vmatprep.mubr.msk.bf16.mxu1 %vm795_vm8, %v1494_v25 }
 0x51e   : > { %v1495_v18 = vpack.c.bf16 %v1493_v47, %v1492_v60 }
 0x520   : > { %1584 = vrot.lane.b32.xlu1 %v1097_v16, %s2952_s1  ;;  %1582 = vrot.lane.b32.xlu0 %v1095_v15, %s2952_s1 }
 0x521   : > { %2035 = vmatmul.mubr.msk.bf16.vlgmr.msra.gmra.mxu1 %vm795_vm8, %v1495_v18 }
 0x58e   : > { %v1579_v27 = vpop.permute.xlu0 %1578  ;;  %v1581_v51 = vpop.permute.xlu1 %1580 }
 0x592   : > { %v1583_v21 = vpop.permute.xlu0 %1582  ;;  %v1585_v58 = vpop.permute.xlu1 %1584 }
 0x5e1   : > { %v2036_v52 = vpop.f32.mrf.mxu1 }
 0x5e2   : > { %v1568_v53 = vadd.f32 %v2036_v52, %v1946_v49 }
 0x5e3   : > { %v1559_v50 = vpop.f32.mrf.mxu1 }
 0x5e4   : > { %v1592_v54 = vadd.f32 %v1583_v21, %v1568_v53  ;;  %v1560_v55 = vadd.f32 %v1946_v49, %v1559_v50 }
 0x5e5   : > { %v2037_v46 = vpop.f32.mrf.mxu1 }
 0x5e6   : > { %v1953_v56 = vmul.f32 -1.442695, %v1592_v54  ;;  %v1590_v3 = vadd.f32 %v1579_v27, %v1560_v55  ;;  %v1571_v57 = vadd.f32 %v2037_v46, %v1946_v49 }
 0x5e7   : > { %v1562_v59 = vpop.f32.mrf.mxu1 }
 0x5e8   : > { %2141 = vpow2.f32 %v1953_v56  ;;  %v1951_v28 = vmul.f32 -1.442695, %v1590_v3  ;;  %v1593_v61 = vadd.f32 %v1585_v58, %v1571_v57  ;;  %v1563_v62 = vadd.f32 %v1946_v49, %v1562_v59 }
 0x5ea   : > { %2143 = vpow2.f32 %v1951_v28  ;;  %v1954_v63 = vmul.f32 -1.442695, %v1593_v61  ;;  %v1591_v1 = vadd.f32 %v1581_v51, %v1563_v62 }
 0x5ec   : > { %2145 = vpow2.f32 %v1954_v63  ;;  %v1952_v4 = vmul.f32 -1.442695, %v1591_v1 }
 0x5ee   : > { %2147 = vpow2.f32 %v1952_v4 }
 0x5f5   : > { %v2142_v8 = vpop.eup %2141 }
 0x5f6   : > { %v1608_v7 = vadd.f32 1.0, %v2142_v8 }
 0x5f7   : > { %v2144_v6 = vpop.eup %2143 }
 0x5f8   : > { %v1606_v9 = vadd.f32 1.0, %v2144_v6 }
 0x5f9   : > { %v2146_v10 = vpop.eup %2145 }
 0x5fa   : > { %2149 = vrcp.f32 %v1606_v9  ;;  %v1609_v12 = vadd.f32 1.0, %v2146_v10 }
 0x5fb   : > { %v2148_v5 = vpop.eup %2147  ;;  %2151 = vrcp.f32 %v1608_v7 }
 0x5fc   : > { %v1607_v11 = vadd.f32 1.0, %v2148_v5 }
 0x5fe   : > { %2153 = vrcp.f32 %v1607_v11 }
 0x5ff   : > { %2155 = vrcp.f32 %v1609_v12 }
 0x607   : > { %v2783_v14 = vpop.eup %2149 }
 0x608   : > { %v1618_v19 = vmul.f32 %v2783_v14, %v1092_v13  ;;  %v2786_v29 = vpop.eup %2151 }
 0x609   : > { %v1620_v39 = vmul.f32 %v2786_v29, %v1096_v17 }
 0x60a   : > { %1626 = vrot.lane.b32.xlu0 %v1618_v19, %s2952_s1 }
 0x60b   : > { %v2793_v20 = vpop.eup %2153 }
 0x60c   : > { %v1619_v22 = vmul.f32 %v2793_v20, %v1094_v30  ;;  %v2797_v26 = vpop.eup %2155  ;;  %v1647_v58 = vsub.f32 1.0, %v2793_v20 }
 0x60d   : > { %v1621_v2 = vmul.f32 %v2797_v26, %v1098_v31 }
 0x60e   : > { %1628 = vrot.lane.b32.xlu1 %v1619_v22, %s2952_s1  ;;  %1630 = vrot.lane.b32.xlu0 %v1620_v39, %s2952_s1 }
 0x612   : > { %1632 = vrot.lane.b32.xlu1 %v1621_v2, %s2952_s1  ;;  %1712 = vperm.xlu0 %2089, %v1708_v32   ;;  %s1772_s1 = sand.u32 127, %s1766_s27 }
 0x613   : > { %s1800_s28 = sadd.s32 %s1967_s21, %s1772_s1  ;;  %s1773_s26 = sadd.s32 %s1955_s2, %s1772_s1 }
 0x614   : > { %s2843_s4 = sld [smem:[#allocation4 + %s1773_s26]] }
 0x615   : > { %s2955_s1 = sld [smem:[#allocation21_spill]] }
 0x616   : > { %1717 = vperm.xlu1 %2090, %v1709_v48   ;;  %1696 = vperm.xlu0 %2089, %v2536_v35  }
 0x61a   : > { %1701 = vperm.xlu1 %2090, %v2546_v43   ;;  %1674 = vrot.lane.b32.xlu0 %v2588_v23, %s2954_s30  ;;  %p1775_p12 = scmp.ne.s32.totalorder %s2843_s4, 4294967295 }
 0x61b   : > { %v1764_v32 = vld [vmem:[%s2955_s1] sm:$0x1] }
 0x61c   : > { %s1776_s27 = scalar_select %p1775_p12, %s2843_s4, 0 }
 0x61d   : > { %s2273_s4 = smov [#allocation8]  }
 0x61e   : > { %1676 = vrot.lane.b32.xlu1 %v2590_v24, %s2954_s30  ;;  %1678 = vrot.lane.b32.xlu0 %v2605_v41, %s2954_s30 }
 0x622   : > { %1680 = vrot.lane.b32.xlu1 %v2607_v42, %s2954_s30 }
 0x67c   : > { %v1627_v33 = vpop.permute.xlu0 %1626 }
 0x67d   : > { %v1638_v25 = vadd.f32 %v1627_v33, %v1560_v55  ;;  %v1648_v55 = vsub.f32 1.0, %v2786_v29 }
 0x680   : > { %v1629_v37 = vpop.permute.xlu1 %1628  ;;  %v1631_v38 = vpop.permute.xlu0 %1630 }
 0x681   : > { %v1640_v44 = vadd.f32 %v1631_v38, %v1568_v53  ;;  %v1639_v45 = vadd.f32 %v1629_v37, %v1563_v62 }
 0x683   : > { %2157 = vtanh.f32 %v1640_v44 }
 0x684   : > { %v1633_v35 = vpop.permute.xlu1 %1632 }
 0x685   : > { %v1641_v43 = vadd.f32 %v1633_v35, %v1571_v57 }
 0x687   : > { %2159 = vtanh.f32 %v1641_v43 }
 0x688   : > { %2161 = vtanh.f32 %v1638_v25  ;;  %v1765_v25 = vld [vmem:[#allocation7] sm:$0x1] }
 0x689   : > { %2163 = vtanh.f32 %v1639_v45 }
 0x68d   : > { %v1713_v47 = vpop.permute.xlu0 %1712 }
 0x68e   : > { %v1720_v16 = vmul.f32 %v1713_v47, %v2588_v23  ;;  %v1721_v27 = vmul.f32 %v1713_v47, %v2590_v24 }
 0x690   : > { %v2158_v36 = vpop.eup %2157 }
 0x691   : > { %1658 = vrot.lane.b32.xlu0 %v2158_v36, %s2951_s3  ;;  %v1718_v15 = vpop.permute.xlu1 %1717  ;;  %v1697_v51 = vpop.permute.xlu0 %1696 }
 0x692   : > { %v1722_v40 = vmul.f32 %v1718_v15, %v2605_v41  ;;  %v1723_v49 = vmul.f32 %v1718_v15, %v2607_v42  ;;  %v1646_v41 = vsub.f32 1.0, %v2783_v14  ;;  %v1649_v42 = vsub.f32 1.0, %v2797_v26 }
 0x694   : > { %v2160_v0 = vpop.eup %2159 }
 0x695   : > { %v2162_v60 = vpop.eup %2161  ;;  %1660 = vrot.lane.b32.xlu1 %v2160_v0, %s2951_s3  ;;  %v1702_v52 = vpop.permute.xlu1 %1701 }
 0x696   : > { %1654 = vrot.lane.b32.xlu0 %v2162_v60, %s2951_s3  ;;  %v2164_v18 = vpop.eup %2163  ;;  %v1675_v23 = vpop.permute.xlu0 %1674 }
 0x697   : > { %v1686_v56 = vmul.f32 %v2783_v14, %v1675_v23 }
 0x699   : > { %1656 = vrot.lane.b32.xlu1 %v2164_v18, %s2951_s3  ;;  %v1677_v53 = vpop.permute.xlu1 %1676 }
 0x69a   : > { %1728 = vrot.lane.b32.xlu0 %v1720_v16, %s2954_s30  ;;  %v1679_v21 = vpop.permute.xlu0 %1678  ;;  %v1687_v62 = vmul.f32 %v2793_v20, %v1677_v53 }
 0x69b   : > { %v1688_v59 = vmul.f32 %v2786_v29, %v1679_v21 }
 0x69d   : > { %1730 = vrot.lane.b32.xlu1 %v1721_v27, %s2954_s30  ;;  %v1681_v50 = vpop.permute.xlu1 %1680  ;;  %v1818_v27 = vstv %s2517_s7  ;;  %s1849_s7 = sshll.u32 %s2273_s4, 4  ;;  %s1850_s7 = int_to_ptr.vmem [resolvable:$true] %s1849_s7 }
 0x69e   : > { %1732 = vrot.lane.b32.xlu0 %v1722_v40, %s2954_s30  ;;  %v1689_v7 = vmul.f32 %v2797_v26, %v1681_v50  ;;  %vm1819_vm14 = vcmp.eq.s32.totalorder %v1818_v27, 1  ;;  %p2216_p3 = scmp.lt.s32.totalorder %s1850_s7, %s1850_s7 }
 0x6a1   : > { %1734 = vrot.lane.b32.xlu1 %v1723_v49, %s2954_s30  ;;  %s2841_s30 = sld [smem:[#allocation4 + %s1800_s28]]  ;;  %s1777_s28 = scalar_lea.vmem [#allocation2], %s1776_s27  ;;  %v1791_v49 = vstv %s2510_s24 }
 0x6a2   : > { %vm1792_vm0 = vcmp.eq.s32.totalorder %v1791_v49, 1  ;;  %s2956_s24 = sadd.s32 4294967295, %s2261_s0   ;;  %s2209_s27 = scalar_lea.vmem %s1850_s7, 32 }
 0x6a3   : > { %p2871_p13 = scmp.eq.s32.totalorder %s2956_s24, 6  ;;  %p2210_p0 = scmp.ne.s32.totalorder %s1850_s7, %s2209_s27 }
 0x6a4   : > { %p2217_p4 = scmp.lt.s32.totalorder %s2209_s27, %s2209_s27 }
 0x6a5   : > { %p2211_p1 = pnand %p2210_p0, %p2871_p13 }
 0x6a6   : > { %p2218_p5 = por %p2217_p4, %p2216_p3 }
 0x6a7   : > { %p1802_p11 = scmp.ne.s32.totalorder %s2841_s30, 4294967295  ;;  %p2212_p2 = pneg %p2211_p1 }
 0x6a9   : > { %s1821_s26 = scalar_select %p1802_p11, 1, 0 }
 0x6aa   : > { %p2219_p6 = pnand %p2218_p5, %p2212_p2 }
 0x6ab   : > { %v1822_v40 = vstv %s1821_s26 }
 0x6ac   : > { %vm1823_vm15 = vcmp.eq.s32.totalorder %v1822_v40, 1 }
 0x703   : > { %v1659_v54 = vpop.permute.xlu0 %1658 }
 0x704   : > { %v1668_v3 = vmul.f32 %v1659_v54, %v1648_v55 }
 0x706   : > { %v1692_v8 = vadd.f32 %v1688_v59, %v1668_v3 }
 0x707   : > { %v1661_v24 = vpop.permute.xlu1 %1660 }
 0x708   : > { %v1655_v46 = vpop.permute.xlu0 %1654  ;;  %v1669_v63 = vmul.f32 %v1661_v24, %v1649_v42  ;;  %v1706_v14 = vmul.f32 %v1702_v52, %v1692_v8 }
 0x709   : > { %v1666_v57 = vmul.f32 %v1655_v46, %v1646_v41  ;;  %v1829_v41 = vstv %s2253_s29  ;;  %v1831_v46 = vld [vmem:[#allocation8] sm:$0x3] }
 0x70a   : > { %v1693_v12 = vadd.f32 %v1689_v7, %v1669_v63  ;;  %vm1830_vm2 = vcmp.eq.s32.totalorder %v2603_v34, %v1829_v41 }
 0x70b   : > { %v1690_v28 = vadd.f32 %v1686_v56, %v1666_v57  ;;  %v1657_v61 = vpop.permute.xlu1 %1656 }
 0x70c   : > { %v1667_v1 = vmul.f32 %v1657_v61, %v1647_v58  ;;  %v1729_v4 = vpop.permute.xlu0 %1728  ;;  %v1707_v17 = vmul.f32 %v1702_v52, %v1693_v12 }
 0x70d   : > { %v1704_v6 = vmul.f32 %v1697_v51, %v1690_v28 }
 0x70e   : > { %v1691_v9 = vadd.f32 %v1687_v62, %v1667_v1 }
 0x70f   : > { %v1740_v10 = vadd.f32 %v1729_v4, %v1704_v6  ;;  %v1731_v5 = vpop.permute.xlu1 %1730 }
 0x710   : > { %v1705_v11 = vmul.f32 %v1697_v51, %v1691_v9  ;;  %v1733_v13 = vpop.permute.xlu0 %1732 }
 0x711   : > { %1748 = vrot.lane.b32.xlu0 %v1740_v10, %s2951_s3  ;;  %v1742_v29 = vadd.f32 %v1733_v13, %v1706_v14 }
 0x712   : > { %v1741_v19 = vadd.f32 %v1731_v5, %v1705_v11 }
 0x713   : > { %v1735_v30 = vpop.permute.xlu1 %1734 }
 0x714   : > { %1750 = vrot.lane.b32.xlu1 %v1741_v19, %s2951_s3  ;;  %v1743_v20 = vadd.f32 %v1735_v30, %v1707_v17 }
 0x715   : > { %1752 = vrot.lane.b32.xlu0 %v1742_v29, %s2951_s3 }
 0x718   : > { %1754 = vrot.lane.b32.xlu1 %v1743_v20, %s2951_s3  ;;  %s1803_s3 = scalar_select %p1802_p11, %s2841_s30, 0 }
 0x71a   : > { %s1871_s21 = scalar_lea.vmem [#allocation2], %s1803_s3 }
 0x71b   : > { %s1794_s3 = scalar_select %p1775_p12, 1, 0 }
 0x71d   : > { %v1795_v51 = vstv %s1794_s3 }
 0x71e   : > { %vm1796_vm1 = vcmp.eq.s32.totalorder %v1795_v51, 1 }
 0x783   : > { %v1749_v22 = vpop.permute.xlu0 %1748 }
 0x784   : > { %1760 = vst.msk [vmem:[#allocation2] sm:$0xff] %vm795_vm8, %v1749_v22 }
 0x786   : > { %v1751_v39 = vpop.permute.xlu1 %1750 }
 0x787   : > { %1761 = vst.msk [vmem:[#allocation2 + $0x8] sm:$0xff] %vm795_vm8, %v1751_v39  ;;  %v1753_v26 = vpop.permute.xlu0 %1752 }
 0x788   : > { %1762 = vst.msk [vmem:[#allocation2 + $0x10] sm:$0xff] %vm795_vm8, %v1753_v26 }
 0x78a   : > { %v1755_v31 = vpop.permute.xlu1 %1754 }
 0x78b   : > { %1763 = vst.msk [vmem:[#allocation2 + $0x18] sm:$0xff] %vm795_vm8, %v1755_v31 }
 0x792   : > { %v1958_v2 = vld [vmem:[%s1871_s21 + $0x10] sm:$0x1]  ;;  %v1778_v48 = vld [vmem:[%s1777_s28] sm:$0x1] }
 0x793   : > { %v1807_v33 = vmul.f32 %v1958_v2, %v1764_v32  ;;  %v1779_v37 = vmul.f32 %v1778_v48, %v1764_v32 }
 0x795   : > { %v1808_v38 = vsel %vm1780_vm13, %v1807_v33, 0.0  ;;  %v1781_v44 = vsel %vm1780_vm13, %v1779_v37, 0.0 }
 0x796   : > { %1809 = vadd.xlane.f32.xlu0 %v1808_v38  ;;  %1782 = vadd.xlane.f32.xlu1 %v1781_v44 }
 0x81f   : > { %v1810_v35 = vpop.xlane.xlu0 %1809  ;;  %v1783_v43 = vpop.xlane.xlu1 %1782 }
 0x820   : > { %v1811_v45 = vadd.f32 %v1810_v35, %v1765_v25  ;;  %v1784_v36 = vadd.f32 %v1783_v43, %v1765_v25 }
 0x822   : > { %v1959_v0 = vmul.f32 -1.442695, %v1811_v45  ;;  %v1956_v60 = vmul.f32 -1.442695, %v1784_v36 }
 0x824   : > { %2165 = vpow2.f32 %v1959_v0 }
 0x825   : > { %2167 = vpow2.f32 %v1956_v60 }
 0x831   : > { %v2166_v47 = vpop.eup %2165 }
 0x832   : > { %v2168_v18 = vpop.eup %2167  ;;  %v1815_v16 = vadd.f32 1.0, %v2166_v47 }
 0x833   : > { %v1788_v15 = vadd.f32 1.0, %v2168_v18 }
 0x834   : > { %2169 = vrcp.f32 %v1815_v16 }
 0x835   : > { %2171 = vrcp.f32 %v1788_v15 }
 0x841   : > { %v2170_v52 = vpop.eup %2169 }
 0x842   : > { %v2172_v23 = vpop.eup %2171  ;;  %v1820_v53 = vsel %vm1819_vm14, %v2170_v52, %v1811_v45 }
 0x843   : > { %v1824_v21 = vsel %vm1823_vm15, %v1820_v53, 0.0  ;;  %v1793_v50 = vsel %vm1792_vm0, %v2172_v23, %v1784_v36 }
 0x844   : > { %v1826_v54 = vrot.slane %v1824_v21, 7  ;;  %v1797_v55 = vsel %vm1796_vm1, %v1793_v50, 0.0 }
 0x846   : > { %v1828_v24 = vsel %vm785_vm3, %v1797_v55, %v1826_v54 }
 0x847   : > { %1834 = vperm.xlu0 %2089, %v1828_v24  }
 0x8c2   : > { %v1835_v56 = vpop.permute.xlu0 %1834 }
 0x8c3   : > { %v1837_v3 = vsel %vm1830_vm2, %v1835_v56, %v1831_v46 }
 0x8c4   : > { %1839 = vst.msk [vmem:[#allocation8] sm:$0x3] %vm1838_vm4, %v1837_v3 }
 0x8c5   : > { %2222 = shalt.err (!%p2219_p6)
}
 0x8c6   : > { %2039 = dma.vmem_to_hbm [thread:$0]  (%p2871_p13), %s1850_s7, 32, %s2915_s23, [#allocation9]  }
 0x8c7   : > { %2248 = dma.done.wait (%p2871_p13), [#allocation9], 32  }
 0x8c8   : > { %2250 = vsyncadd (%p2871_p13), [#allocation9], 4294967264 }
 0x8c9 PF: > { %s50_s0 = sadd.s32 1, %s2261_s0   ;;  %s2958_s29 = smov %s2257_s5 }
 0x8ca   : > { %p47_p7 = scmp.ge.s32.totalorder %s50_s0, 9   ;;  %s2959_s5 = smov %s2961_s6 }
 0x8cc   :  { %49 = sbr.rel (!%p47_p7) target bundleno = 53 (0x35), region = 135 }
 0x8d1   :  { %1862 = vsyncpa [#allocation9], 1 }
 0x8d2   :  { %1864 = vsyncpa [#allocation9 + $0x1], 1 }

</bundles_post_ra>
